<compile_context>
chip_gen: v7x
topology: tpu7x:2x2x1
jax: 0.10.0
libtpu: 0.0.40
codegen_flags: <defaults>
</compile_context>

<pallas_src>
import functools

import jax
import jax.numpy as jnp
from jax.experimental import pallas as pl
from jax.experimental.pallas import tpu as pltpu


def _round_up(x: int, m: int) -> int:
    return ((x + m - 1) // m) * m


def _renorm_kernel(emb_ref, out_ref, *, onlymax: bool):
    """Normalize every row (last axis = embedding_size) of the current tile."""
    x = emb_ref[...].astype(jnp.float32)
    # Cross-lane reduce (XLU slot): sum of squares over embedding_size.
    sumsq = jnp.sum(x * x, axis=-1, keepdims=True)
    norm = jnp.sqrt(sumsq)
    if onlymax:
        # torch.clip(norm, min=1)
        norm = jnp.maximum(norm, 1.0)
    # One exact divide per row (f32 parity with the PyTorch reference), then a
    # single VPU broadcast-multiply over the whole tile.
    inv = 1.0 / norm
    out_ref[...] = (x * inv).astype(out_ref.dtype)


def normed_embedding_pallas(table: jax.Array, *, onlymax: bool = True,
                            tile_rows: int = 512) -> jax.Array:
    """normalize_embedding(table, dim=1, onlymax=onlymax) as a Pallas TPU kernel."""
    n, d = table.shape
    d_pad = _round_up(max(d, 1), 128)                       # lane-dense last axis
    tile = min(_round_up(max(n, 1), 8), _round_up(tile_rows, 8))
    n_pad = _round_up(n, tile)

    padded = table
    if (n_pad, d_pad) != (n, d):
        # Zero padding does not change per-row norms; padded rows/cols are
        # sliced off below.
        padded = jnp.pad(table, ((0, n_pad - n), (0, d_pad - d)))

    block = pl.BlockSpec((tile, d_pad), lambda i: (i, 0))

    out = pl.pallas_call(
        functools.partial(_renorm_kernel, onlymax=onlymax),
        out_shape=jax.ShapeDtypeStruct((n_pad, d_pad), table.dtype),
        grid_spec=pltpu.PrefetchScalarGridSpec(
            num_scalar_prefetch=0,
            grid=(n_pad // tile,),
            in_specs=[block],
            out_specs=block,
        ),
        compiler_params=pltpu.CompilerParams(
            # Independent row tiles -> shard across TensorCores (megacore).
            dimension_semantics=("parallel",),
            vmem_limit_bytes=64 * 1024 * 1024,
        ),
    )(padded)
    return out[:n, :d]


def _normed_embedding_ref(table: jax.Array, onlymax: bool = True) -> jax.Array:
    """Pure-JAX reference (mirrors the PyTorch normalize_embedding)."""
    norm = jnp.sqrt(jnp.sum(table.astype(jnp.float32) ** 2, axis=1, keepdims=True))
    if onlymax:
        norm = jnp.maximum(norm, 1.0)
    return (table / norm).astype(table.dtype)


class EmbeddingContainer:
    """JAX/Pallas equivalent of the PyTorch EmbeddingContainer module."""

    def __init__(self, embedding_n: int, embedding_size: int = 10,
                 onlymax: bool = True, *, key=None):
        self.embedding_n = embedding_n
        self.embedding_size = embedding_size
        self.onlymax = onlymax
        if key is None:
            key = jax.random.PRNGKey(0)
        # torch.nn.init.normal_ -> standard normal, f32.
        self.embedding = jax.random.normal(
            key, (embedding_n, embedding_size), dtype=jnp.float32)

    def normed_embedding(self, onlymax=None):
        om = self.onlymax if onlymax is None else onlymax
        # TODO(synk): detach_norm (stop-gradient on the norm) is an autograd
        # detail; this port is forward-only.
        return normed_embedding_pallas(self.embedding, onlymax=om)

    def forward(self, x):
        # Identity pass-through, exactly like the PyTorch module (no kernel).
        return x

    __call__ = forward


if __name__ == "__main__":
    key = jax.random.PRNGKey(0)
    k_emb, k_x = jax.random.split(key, 2)

    embedding_n, embedding_size = 512, 32
    module = EmbeddingContainer(embedding_n, embedding_size, onlymax=True, key=k_emb)
    # Shrink the first 128 rows so their norms fall below 1 and the
    # clip(norm, min=1) branch is actually exercised.
    row_scale = jnp.where(jnp.arange(embedding_n)[:, None] < 128, 0.05, 1.0)
    module.embedding = module.embedding * row_scale

    # forward(x): identity (no kernel, no HBM traffic).
    x = jax.random.normal(k_x, (2, 4, 16, 16), dtype=jnp.float32)
    y = module.forward(x)
    assert y.shape == x.shape and bool(jnp.all(y == x))

    # Pallas renorm kernel vs pure-JAX reference, both onlymax branches.
    for om in (True, False):
        got = jax.block_until_ready(module.normed_embedding(onlymax=om))
        want = _normed_embedding_ref(module.embedding, onlymax=om)
        assert got.shape == (embedding_n, embedding_size)
        max_err = float(jnp.max(jnp.abs(got - want)))
        assert jnp.allclose(got, want, rtol=1e-5, atol=1e-6), (
            f"onlymax={om}: max abs err={max_err}")

    print("KERNEL_OK")
</pallas_src>

<mosaic_0001>
module attributes {stable_mosaic.version = 11 : i64} {
  func.func @_renorm_kernel(%arg0: i32, %arg1: memref<512x128xf32, #tpu.memory_space<vmem>>, %arg2: memref<512x128xf32, #tpu.memory_space<vmem>>) attributes {dimension_semantics = [#tpu.dimension_semantics<parallel>], iteration_bounds = array<i64: 1>, scalar_prefetch = 0 : i64, scratch_operands = 0 : i64, tpu.core_type = #tpu.core_type<tc>, window_params = [{transform_indices = @transform_0, window_bounds = array<i64: 512, 128>}, {transform_indices = @transform_1, window_bounds = array<i64: 512, 128>}]} {
    %c0 = arith.constant 0 : index
    %c0_0 = arith.constant 0 : index
    %0 = vector.load %arg1[%c0, %c0_0] : memref<512x128xf32, #tpu.memory_space<vmem>>, vector<512x128xf32>
    %1 = arith.mulf %0, %0 : vector<512x128xf32>
    %cst = arith.constant dense<0.000000e+00> : vector<512xf32>
    %2 = vector.multi_reduction <add>, %1, %cst [1] : vector<512x128xf32> to vector<512xf32>
    %3 = vector.shape_cast %2 : vector<512xf32> to vector<512x1xf32>
    %4 = math.sqrt %3 : vector<512x1xf32>
    %cst_1 = arith.constant 1.000000e+00 : f32
    %5 = vector.broadcast %cst_1 : f32 to vector<512x1xf32>
    %6 = arith.maximumf %4, %5 : vector<512x1xf32>
    %cst_2 = arith.constant 1.000000e+00 : f32
    %7 = vector.broadcast %cst_2 : f32 to vector<512x1xf32>
    %8 = arith.divf %7, %6 : vector<512x1xf32>
    %9 = vector.broadcast %8 : vector<512x1xf32> to vector<512x128xf32>
    %10 = arith.mulf %0, %9 : vector<512x128xf32>
    %c0_3 = arith.constant 0 : index
    %c0_4 = arith.constant 0 : index
    %11 = vector.load %arg2[%c0_3, %c0_4] : memref<512x128xf32, #tpu.memory_space<vmem>>, vector<512x128xf32>
    tpu.vector_store %arg2[%c0_3, %c0_4], %10 {strides = array<i32>} : memref<512x128xf32, #tpu.memory_space<vmem>>, vector<512x128xf32>,
    return
  }
  func.func @transform_0(%arg0: i32) -> (i32, i32) {
    %c0_i32 = arith.constant 0 : i32
    %c0_i32_0 = arith.constant 0 : i32
    return %arg0, %c0_i32 : i32, i32
  }
  func.func @transform_1(%arg0: i32) -> (i32, i32) {
    %c0_i32 = arith.constant 0 : i32
    %c0_i32_0 = arith.constant 0 : i32
    return %arg0, %c0_i32 : i32, i32
  }
}

</mosaic_0001>

<bundles_post_ra>
// kernel: tpu_custom_call.1
= control target key start
LH: loop header
LB: loop body
LE: loop exit
PB: predicated region body
PF: predicated region fallthrough
CT: control target
= control target key end

     0   :  { %6 = vsyncpa [#allocation3], 0  ;;  %s2216_s0 = inlined_call_operand.hbm [shape: f32[512,128], index: 0, kind: input, shape index: {}]   ;;  %s2217_s1 = inlined_call_operand.hbm [shape: f32[512,128], index: 1, kind: output, shape index: {}]  }
   0x1   :  { %7 = vsyncpa [#allocation4], 0  ;;  %s1415_s6 = smov [#allocation2]   ;;  %s1367_s10 = scalar_lea.hbm %s2216_s0, 8192 }
   0x2   :  { %s13_s7 = sshll.u32 %s1415_s6, 4  ;;  %p1368_p0 = scmp.ne.s32.totalorder %s2216_s0, %s1367_s10  ;;  %s14_s7 = int_to_ptr.vmem [resolvable:$true] %s13_s7 }
   0x3   :  { %p1371_p1 = scmp.lt.u32.totalorder %s1367_s10, %s2216_s0 }
   0x5   :  { %p1373_p2 = pnand %p1371_p1, %p1368_p0 }
   0x7   :  { %1376 = shalt.err (!%p1373_p2)
}
   0x8   :  { %s1377_s15 = scalar_lea.vmem %s14_s7, 8192  ;;  %p1382_p4 = scmp.lt.s32.totalorder %s14_s7, %s14_s7 }
   0x9   :  { %p1378_p3 = scmp.ne.s32.totalorder %s14_s7, %s1377_s15  ;;  %p1383_p5 = scmp.lt.s32.totalorder %s1377_s15, %s1377_s15 }
   0xb   :  { %p1384_p6 = por %p1383_p5, %p1382_p4 }
   0xd   :  { %p1385_p7 = pnand %p1384_p6, %p1378_p3 }
   0xf   :  { %1388 = shalt.err (!%p1385_p7)
}
  0x10   :  { %s1416_s16 = smov 128   ;;  %s1417_s17 = smov 8  }
  0x11   :  { %19 = dma.hbm_to_vmem [thread:$0]  %s2216_s0, 8192, %s14_s7, [#allocation3], %s1416_s16, %s1416_s16, %s1417_s17  }
  0x12   :  { %1411 = dma.done.wait [#allocation3], 8192  }
  0x13   :  { %1412 = vsyncadd [#allocation3], 4294959104  ;;  %v1444_v0 = vld [vmem:[#allocation2 + $0x10] sm:$0xff]  ;;  %v1446_v1 = vld [vmem:[#allocation2] sm:$0xff]  ;;  %s1418_s0 = smov [#allocation5]  }
  0x14   :  { %v1448_v2 = vld [vmem:[#allocation2 + $0x18] sm:$0xff]  ;;  %v89_v3 = vmul.f32 %v1444_v0, %v1444_v0  ;;  %v87_v4 = vmul.f32 %v1446_v1, %v1446_v1  ;;  %v1454_v5 = vld [vmem:[#allocation2 + $0x8] sm:$0xff]  ;;  %v1462_v9 = vld [vmem:[#allocation2 + $0x20] sm:$0xff]  ;;  %s1052_s20 = sshll.u32 %s1418_s0, 4  ;;  %s1053_s20 = int_to_ptr.vmem [resolvable:$true] %s1052_s20 }
  0x15   :  { %v90_v6 = vmul.f32 %v1448_v2, %v1448_v2  ;;  %v88_v7 = vmul.f32 %v1454_v5, %v1454_v5  ;;  %v1460_v8 = vld [vmem:[#allocation2 + $0x28] sm:$0xff]  ;;  %v91_v11 = vmul.f32 %v1462_v9, %v1462_v9  ;;  %v1468_v12 = vld [vmem:[#allocation2 + $0x38] sm:$0xff]  ;;  %v1470_v13 = vld [vmem:[#allocation2 + $0x30] sm:$0xff]  ;;  %s1389_s21 = scalar_lea.vmem %s1053_s20, 8192  ;;  %p1394_p9 = scmp.lt.s32.totalorder %s1053_s20, %s1053_s20 }
  0x16   :  { %155 = vadd.xlane.f32.xlu1 %v89_v3  ;;  %151 = vadd.xlane.f32.xlu0 %v87_v4  ;;  %v92_v10 = vmul.f32 %v1460_v8, %v1460_v8  ;;  %v94_v14 = vmul.f32 %v1468_v12, %v1468_v12  ;;  %v93_v15 = vmul.f32 %v1470_v13, %v1470_v13  ;;  %v1476_v16 = vld [vmem:[#allocation2 + $0x48] sm:$0xff]  ;;  %v1478_v17 = vld [vmem:[#allocation2 + $0x40] sm:$0xff]  ;;  %v1484_v20 = vld [vmem:[#allocation2 + $0x58] sm:$0xff]  ;;  %p1390_p8 = scmp.ne.s32.totalorder %s1053_s20, %s1389_s21  ;;  %p1395_p10 = scmp.lt.s32.totalorder %s1389_s21, %s1389_s21 }
  0x17   :  { %v96_v18 = vmul.f32 %v1476_v16, %v1476_v16  ;;  %v95_v19 = vmul.f32 %v1478_v17, %v1478_v17  ;;  %v1486_v21 = vld [vmem:[#allocation2 + $0x50] sm:$0xff]  ;;  %v98_v22 = vmul.f32 %v1484_v20, %v1484_v20  ;;  %v1492_v24 = vld [vmem:[#allocation2 + $0x68] sm:$0xff]  ;;  %v1494_v25 = vld [vmem:[#allocation2 + $0x60] sm:$0xff] }
  0x18   :  { %v97_v23 = vmul.f32 %v1486_v21, %v1486_v21  ;;  %v100_v26 = vmul.f32 %v1492_v24, %v1492_v24  ;;  %v99_v27 = vmul.f32 %v1494_v25, %v1494_v25  ;;  %v1500_v28 = vld [vmem:[#allocation2 + $0x78] sm:$0xff]  ;;  %v1502_v29 = vld [vmem:[#allocation2 + $0x70] sm:$0xff]  ;;  %v1508_v32 = vld [vmem:[#allocation2 + $0x88] sm:$0xff]  ;;  %p1396_p11 = por %p1395_p10, %p1394_p9 }
  0x19   :  { %v102_v30 = vmul.f32 %v1500_v28, %v1500_v28  ;;  %v101_v31 = vmul.f32 %v1502_v29, %v1502_v29  ;;  %v1510_v33 = vld [vmem:[#allocation2 + $0x80] sm:$0xff]  ;;  %v104_v34 = vmul.f32 %v1508_v32, %v1508_v32  ;;  %v1516_v36 = vld [vmem:[#allocation2 + $0x98] sm:$0xff]  ;;  %v1518_v37 = vld [vmem:[#allocation2 + $0x90] sm:$0xff] }
  0x1a   :  { %157 = vadd.xlane.f32.xlu1 %v90_v6  ;;  %153 = vadd.xlane.f32.xlu0 %v88_v7  ;;  %v103_v35 = vmul.f32 %v1510_v33, %v1510_v33  ;;  %v106_v38 = vmul.f32 %v1516_v36, %v1516_v36  ;;  %v105_v39 = vmul.f32 %v1518_v37, %v1518_v37  ;;  %v1524_v40 = vld [vmem:[#allocation2 + $0xa8] sm:$0xff]  ;;  %v43_v41 = vld [vmem:[#allocation2 + $0xa0] sm:$0xff]  ;;  %v46_v44 = vld [vmem:[#allocation2 + $0xb8] sm:$0xff]  ;;  %p1397_p12 = pnand %p1396_p11, %p1390_p8 }
  0x1b   :  { %v108_v42 = vmul.f32 %v1524_v40, %v1524_v40  ;;  %v107_v43 = vmul.f32 %v43_v41, %v43_v41  ;;  %v45_v45 = vld [vmem:[#allocation2 + $0xb0] sm:$0xff]  ;;  %v110_v46 = vmul.f32 %v46_v44, %v46_v44  ;;  %v48_v48 = vld [vmem:[#allocation2 + $0xc8] sm:$0xff]  ;;  %v47_v49 = vld [vmem:[#allocation2 + $0xc0] sm:$0xff] }
  0x1c   :  { %v109_v47 = vmul.f32 %v45_v45, %v45_v45  ;;  %v112_v50 = vmul.f32 %v48_v48, %v48_v48  ;;  %v111_v51 = vmul.f32 %v47_v49, %v47_v49  ;;  %v50_v52 = vld [vmem:[#allocation2 + $0xd8] sm:$0xff]  ;;  %v49_v53 = vld [vmem:[#allocation2 + $0xd0] sm:$0xff]  ;;  %v52_v56 = vld [vmem:[#allocation2 + $0xe8] sm:$0xff] }
  0x1d   :  { %v114_v54 = vmul.f32 %v50_v52, %v50_v52  ;;  %v113_v55 = vmul.f32 %v49_v53, %v49_v53  ;;  %v51_v57 = vld [vmem:[#allocation2 + $0xe0] sm:$0xff]  ;;  %v116_v58 = vmul.f32 %v52_v56, %v52_v56  ;;  %v54_v60 = vld [vmem:[#allocation2 + $0xf8] sm:$0xff]  ;;  %v53_v61 = vld [vmem:[#allocation2 + $0xf0] sm:$0xff] }
  0x1e   :  { %161 = vadd.xlane.f32.xlu1 %v92_v10  ;;  %159 = vadd.xlane.f32.xlu0 %v91_v11  ;;  %v115_v59 = vmul.f32 %v51_v57, %v51_v57  ;;  %v118_v62 = vmul.f32 %v54_v60, %v54_v60  ;;  %v117_v63 = vmul.f32 %v53_v61, %v53_v61  ;;  %v56_v3 = vld [vmem:[#allocation2 + $0x108] sm:$0xff]  ;;  %v55_v4 = vld [vmem:[#allocation2 + $0x100] sm:$0xff]  ;;  %v58_v10 = vld [vmem:[#allocation2 + $0x118] sm:$0xff] }
  0x1f   :  { %v120_v6 = vmul.f32 %v56_v3, %v56_v3  ;;  %v119_v7 = vmul.f32 %v55_v4, %v55_v4  ;;  %v57_v11 = vld [vmem:[#allocation2 + $0x110] sm:$0xff]  ;;  %v66_v41 = vld [vmem:[#allocation2 + $0x158] sm:$0xff]  ;;  %v68_v45 = vld [vmem:[#allocation2 + $0x168] sm:$0xff] }
  0x20   :  { %v70_v49 = vld [vmem:[#allocation2 + $0x178] sm:$0xff]  ;;  %v72_v53 = vld [vmem:[#allocation2 + $0x188] sm:$0xff] }
  0x21   :  { %v74_v57 = vld [vmem:[#allocation2 + $0x198] sm:$0xff]  ;;  %v76_v61 = vld [vmem:[#allocation2 + $0x1a8] sm:$0xff] }
  0x22   :  { %165 = vadd.xlane.f32.xlu1 %v94_v14  ;;  %163 = vadd.xlane.f32.xlu0 %v93_v15  ;;  %v122_v14 = vmul.f32 %v58_v10, %v58_v10  ;;  %v121_v15 = vmul.f32 %v57_v11, %v57_v11  ;;  %v78_v4 = vld [vmem:[#allocation2 + $0x1b8] sm:$0xff]  ;;  %v80_v11 = vld [vmem:[#allocation2 + $0x1c8] sm:$0xff] }
  0x26   :  { %169 = vadd.xlane.f32.xlu1 %v96_v18  ;;  %167 = vadd.xlane.f32.xlu0 %v95_v19  ;;  %v60_v18 = vld [vmem:[#allocation2 + $0x128] sm:$0xff]  ;;  %v59_v19 = vld [vmem:[#allocation2 + $0x120] sm:$0xff] }
  0x2a   :  { %173 = vadd.xlane.f32.xlu1 %v98_v22  ;;  %171 = vadd.xlane.f32.xlu0 %v97_v23  ;;  %v124_v22 = vmul.f32 %v60_v18, %v60_v18  ;;  %v123_v23 = vmul.f32 %v59_v19, %v59_v19  ;;  %v82_v19 = vld [vmem:[#allocation2 + $0x1d8] sm:$0xff] }
  0x2e   :  { %177 = vadd.xlane.f32.xlu1 %v100_v26  ;;  %175 = vadd.xlane.f32.xlu0 %v99_v27  ;;  %v62_v26 = vld [vmem:[#allocation2 + $0x138] sm:$0xff]  ;;  %v61_v27 = vld [vmem:[#allocation2 + $0x130] sm:$0xff] }
  0x32   :  { %181 = vadd.xlane.f32.xlu1 %v102_v30  ;;  %179 = vadd.xlane.f32.xlu0 %v101_v31  ;;  %v126_v30 = vmul.f32 %v62_v26, %v62_v26  ;;  %v125_v31 = vmul.f32 %v61_v27, %v61_v27  ;;  %v84_v27 = vld [vmem:[#allocation2 + $0x1e8] sm:$0xff] }
  0x36   :  { %185 = vadd.xlane.f32.xlu1 %v104_v34  ;;  %183 = vadd.xlane.f32.xlu0 %v103_v35  ;;  %v64_v34 = vld [vmem:[#allocation2 + $0x148] sm:$0xff]  ;;  %v63_v35 = vld [vmem:[#allocation2 + $0x140] sm:$0xff] }
  0x3a   :  { %189 = vadd.xlane.f32.xlu1 %v106_v38  ;;  %187 = vadd.xlane.f32.xlu0 %v105_v39  ;;  %v128_v38 = vmul.f32 %v64_v34, %v64_v34  ;;  %v127_v39 = vmul.f32 %v63_v35, %v63_v35  ;;  %v86_v35 = vld [vmem:[#allocation2 + $0x1f8] sm:$0xff] }
  0x3e   :  { %193 = vadd.xlane.f32.xlu1 %v108_v42  ;;  %191 = vadd.xlane.f32.xlu0 %v107_v43  ;;  %v65_v42 = vld [vmem:[#allocation2 + $0x150] sm:$0xff]  ;;  %v130_v43 = vmul.f32 %v66_v41, %v66_v41 }
  0x3f   :  { %v129_v44 = vmul.f32 %v65_v42, %v65_v42 }
  0x42   :  { %197 = vadd.xlane.f32.xlu1 %v110_v46  ;;  %195 = vadd.xlane.f32.xlu0 %v109_v47  ;;  %v67_v46 = vld [vmem:[#allocation2 + $0x160] sm:$0xff]  ;;  %v132_v47 = vmul.f32 %v68_v45, %v68_v45 }
  0x43   :  { %v131_v48 = vmul.f32 %v67_v46, %v67_v46 }
  0x46   :  { %201 = vadd.xlane.f32.xlu1 %v112_v50  ;;  %199 = vadd.xlane.f32.xlu0 %v111_v51  ;;  %v69_v50 = vld [vmem:[#allocation2 + $0x170] sm:$0xff]  ;;  %v134_v51 = vmul.f32 %v70_v49, %v70_v49 }
  0x47   :  { %v133_v52 = vmul.f32 %v69_v50, %v69_v50 }
  0x4a   :  { %205 = vadd.xlane.f32.xlu1 %v114_v54  ;;  %203 = vadd.xlane.f32.xlu0 %v113_v55  ;;  %v71_v54 = vld [vmem:[#allocation2 + $0x180] sm:$0xff]  ;;  %v136_v55 = vmul.f32 %v72_v53, %v72_v53 }
  0x4b   :  { %v135_v56 = vmul.f32 %v71_v54, %v71_v54 }
  0x4e   :  { %209 = vadd.xlane.f32.xlu1 %v116_v58  ;;  %207 = vadd.xlane.f32.xlu0 %v115_v59  ;;  %v73_v58 = vld [vmem:[#allocation2 + $0x190] sm:$0xff]  ;;  %v138_v59 = vmul.f32 %v74_v57, %v74_v57 }
  0x4f   :  { %v137_v60 = vmul.f32 %v73_v58, %v73_v58 }
  0x52   :  { %213 = vadd.xlane.f32.xlu1 %v118_v62  ;;  %211 = vadd.xlane.f32.xlu0 %v117_v63  ;;  %v75_v62 = vld [vmem:[#allocation2 + $0x1a0] sm:$0xff]  ;;  %v140_v63 = vmul.f32 %v76_v61, %v76_v61 }
  0x53   :  { %v139_v3 = vmul.f32 %v75_v62, %v75_v62 }
  0x56   :  { %217 = vadd.xlane.f32.xlu1 %v120_v6  ;;  %215 = vadd.xlane.f32.xlu0 %v119_v7  ;;  %v77_v6 = vld [vmem:[#allocation2 + $0x1b0] sm:$0xff]  ;;  %v142_v7 = vmul.f32 %v78_v4, %v78_v4 }
  0x57   :  { %v141_v10 = vmul.f32 %v77_v6, %v77_v6 }
  0x5a   :  { %221 = vadd.xlane.f32.xlu1 %v122_v14  ;;  %219 = vadd.xlane.f32.xlu0 %v121_v15  ;;  %v79_v14 = vld [vmem:[#allocation2 + $0x1c0] sm:$0xff]  ;;  %v144_v15 = vmul.f32 %v80_v11, %v80_v11 }
  0x5b   :  { %v143_v18 = vmul.f32 %v79_v14, %v79_v14 }
  0x5e   :  { %225 = vadd.xlane.f32.xlu1 %v124_v22  ;;  %223 = vadd.xlane.f32.xlu0 %v123_v23  ;;  %v81_v22 = vld [vmem:[#allocation2 + $0x1d0] sm:$0xff]  ;;  %v146_v23 = vmul.f32 %v82_v19, %v82_v19 }
  0x5f   :  { %v145_v26 = vmul.f32 %v81_v22, %v81_v22 }
  0x62   :  { %229 = vadd.xlane.f32.xlu1 %v126_v30  ;;  %227 = vadd.xlane.f32.xlu0 %v125_v31  ;;  %v83_v30 = vld [vmem:[#allocation2 + $0x1e0] sm:$0xff]  ;;  %v148_v31 = vmul.f32 %v84_v27, %v84_v27 }
  0x63   :  { %v147_v34 = vmul.f32 %v83_v30, %v83_v30 }
  0x66   :  { %233 = vadd.xlane.f32.xlu1 %v128_v38  ;;  %231 = vadd.xlane.f32.xlu0 %v127_v39  ;;  %v85_v38 = vld [vmem:[#allocation2 + $0x1f0] sm:$0xff]  ;;  %v150_v39 = vmul.f32 %v86_v35, %v86_v35 }
  0x67   :  { %v149_v41 = vmul.f32 %v85_v38, %v85_v38 }
  0x6a   :  { %237 = vadd.xlane.f32.xlu1 %v130_v43  ;;  %235 = vadd.xlane.f32.xlu0 %v129_v44 }
  0x6e   :  { %241 = vadd.xlane.f32.xlu1 %v132_v47  ;;  %239 = vadd.xlane.f32.xlu0 %v131_v48 }
  0x72   :  { %245 = vadd.xlane.f32.xlu1 %v134_v51  ;;  %243 = vadd.xlane.f32.xlu0 %v133_v52 }
  0x76   :  { %249 = vadd.xlane.f32.xlu1 %v136_v55  ;;  %247 = vadd.xlane.f32.xlu0 %v135_v56 }
  0x7a   :  { %253 = vadd.xlane.f32.xlu1 %v138_v59  ;;  %251 = vadd.xlane.f32.xlu0 %v137_v60 }
  0x7e   :  { %257 = vadd.xlane.f32.xlu1 %v140_v63  ;;  %255 = vadd.xlane.f32.xlu0 %v139_v3 }
  0x82   :  { %261 = vadd.xlane.f32.xlu1 %v142_v7  ;;  %259 = vadd.xlane.f32.xlu0 %v141_v10 }
  0x86   :  { %265 = vadd.xlane.f32.xlu1 %v144_v15  ;;  %263 = vadd.xlane.f32.xlu0 %v143_v18 }
  0x8a   :  { %269 = vadd.xlane.f32.xlu1 %v146_v23  ;;  %267 = vadd.xlane.f32.xlu0 %v145_v26 }
  0x8e   :  { %273 = vadd.xlane.f32.xlu1 %v148_v31  ;;  %271 = vadd.xlane.f32.xlu0 %v147_v34 }
  0x92   :  { %277 = vadd.xlane.f32.xlu1 %v150_v39  ;;  %275 = vadd.xlane.f32.xlu0 %v149_v41 }
  0xa3   :  { %v156_v42 = vpop.xlane.xlu1 %155  ;;  %v152_v43 = vpop.xlane.xlu0 %151 }
  0xa4   :  { %1068 = vrsqrt.f32 %v156_v42  ;;  %vm295_vm0 = vcmp.eq.f32.partialorder %v156_v42, inf  ;;  %vm297_vm1 = vcmp.eq.f32.partialorder %v156_v42, 0.0  ;;  %v298_v49 = vand.u32 2147483648, %v156_v42 }
  0xa5   :  { %1070 = vrsqrt.f32 %v152_v43  ;;  %vm281_vm2 = vcmp.eq.f32.partialorder %v152_v43, inf  ;;  %vm283_vm3 = vcmp.eq.f32.partialorder %v152_v43, 0.0  ;;  %v284_v52 = vand.u32 2147483648, %v152_v43 }
  0xa7   :  { %v158_v44 = vpop.xlane.xlu1 %157  ;;  %v154_v45 = vpop.xlane.xlu0 %153 }
  0xa8   :  { %1072 = vrsqrt.f32 %v158_v44  ;;  %vm302_vm4 = vcmp.eq.f32.partialorder %v158_v44, inf  ;;  %vm304_vm5 = vcmp.eq.f32.partialorder %v158_v44, 0.0  ;;  %v305_v57 = vand.u32 2147483648, %v158_v44 }
  0xa9   :  { %1074 = vrsqrt.f32 %v154_v45  ;;  %vm288_vm6 = vcmp.eq.f32.partialorder %v154_v45, inf  ;;  %vm290_vm7 = vcmp.eq.f32.partialorder %v154_v45, 0.0  ;;  %v291_v61 = vand.u32 2147483648, %v154_v45 }
  0xab   :  { %v1528_v46 = vpop.xlane.xlu1 %161  ;;  %v1530_v47 = vpop.xlane.xlu0 %159 }
  0xac   :  { %1076 = vrsqrt.f32 %v1528_v46  ;;  %vm316_vm8 = vcmp.eq.f32.partialorder %v1528_v46, inf  ;;  %vm318_vm9 = vcmp.eq.f32.partialorder %v1528_v46, 0.0  ;;  %v319_v15 = vand.u32 2147483648, %v1528_v46 }
  0xad   :  { %1078 = vrsqrt.f32 %v1530_v47  ;;  %vm309_vm10 = vcmp.eq.f32.partialorder %v1530_v47, inf  ;;  %vm311_vm11 = vcmp.eq.f32.partialorder %v1530_v47, 0.0  ;;  %v312_v39 = vand.u32 2147483648, %v1530_v47 }
  0xae   :  { %v1069_v48 = vpop.eup %1068 }
  0xaf   :  { %v1071_v50 = vpop.eup %1070  ;;  %v294_v51 = vmul.f32 %v1069_v48, %v156_v42  ;;  %v1534_v53 = vpop.xlane.xlu1 %165 }
  0xb0   :  { %v1536_v54 = vpop.xlane.xlu0 %163  ;;  %v280_v55 = vmul.f32 %v1071_v50, %v152_v43  ;;  %1080 = vrsqrt.f32 %v1534_v53  ;;  %vm330_vm12 = vcmp.eq.f32.partialorder %v1534_v53, inf  ;;  %vm332_vm13 = vcmp.eq.f32.partialorder %v1534_v53, 0.0 }
  0xb1   :  { %v296_v56 = vsel %vm295_vm0, %v156_v42, %v294_v51  ;;  %1082 = vrsqrt.f32 %v1536_v54  ;;  %v333_v42 = vand.u32 2147483648, %v1534_v53  ;;  %vm323_vm14 = vcmp.eq.f32.partialorder %v1536_v54, inf }
  0xb2   :  { %v1073_v58 = vpop.eup %1072  ;;  %v299_v59 = vsel %vm297_vm1, %v298_v49, %v296_v56  ;;  %v282_v60 = vsel %vm281_vm2, %v152_v43, %v280_v55  ;;  %vm325_vm15 = vcmp.eq.f32.partialorder %v1536_v54, 0.0 }
  0xb3   :  { %v1075_v62 = vpop.eup %1074  ;;  %v729_v63 = vmax.f32 %v299_v59, 1.0  ;;  %v285_v3 = vsel %vm283_vm3, %v284_v52, %v282_v60  ;;  %v301_v4 = vmul.f32 %v1073_v58, %v158_v44  ;;  %v1543_v6 = vpop.xlane.xlu1 %169 }
  0xb4   :  { %v1545_v7 = vpop.xlane.xlu0 %167  ;;  %v727_v10 = vmax.f32 %v285_v3, 1.0  ;;  %v287_v11 = vmul.f32 %v1075_v62, %v154_v45  ;;  %1084 = vrsqrt.f32 %v1543_v6  ;;  %vm344_vm0 = vcmp.eq.f32.partialorder %v1543_v6, inf }
  0xb5   :  { %1086 = vrcp.f32 %v729_v63  ;;  %v303_v14 = vsel %vm302_vm4, %v158_v44, %v301_v4  ;;  %vm346_vm1 = vcmp.eq.f32.partialorder %v1543_v6, 0.0  ;;  %vm337_vm2 = vcmp.eq.f32.partialorder %v1545_v7, inf }
  0xb6   :  { %v1077_v18 = vpop.eup %1076  ;;  %1088 = vrcp.f32 %v727_v10  ;;  %v306_v19 = vsel %vm304_vm5, %v305_v57, %v303_v14  ;;  %v289_v22 = vsel %vm288_vm6, %v154_v45, %v287_v11  ;;  %v326_v57 = vand.u32 2147483648, %v1536_v54 }
  0xb7   :  { %v1079_v23 = vpop.eup %1078  ;;  %v730_v26 = vmax.f32 %v306_v19, 1.0  ;;  %v292_v27 = vsel %vm290_vm7, %v291_v61, %v289_v22  ;;  %v315_v30 = vmul.f32 %v1077_v18, %v1528_v46  ;;  %1090 = vrsqrt.f32 %v1545_v7  ;;  %v1558_v31 = vpop.xlane.xlu1 %173 }
  0xb8   :  { %v1560_v34 = vpop.xlane.xlu0 %171  ;;  %v728_v35 = vmax.f32 %v292_v27, 1.0  ;;  %v308_v38 = vmul.f32 %v1079_v23, %v1530_v47  ;;  %vm339_vm3 = vcmp.eq.f32.partialorder %v1545_v7, 0.0  ;;  %v340_v23 = vand.u32 2147483648, %v1545_v7 }
  0xb9   :  { %1092 = vrcp.f32 %v730_v26  ;;  %v317_v41 = vsel %vm316_vm8, %v1528_v46, %v315_v30  ;;  %vm358_vm4 = vcmp.eq.f32.partialorder %v1558_v31, inf  ;;  %vm360_vm5 = vcmp.eq.f32.partialorder %v1558_v31, 0.0 }
  0xba   :  { %v1081_v43 = vpop.eup %1080  ;;  %1094 = vrcp.f32 %v728_v35  ;;  %v320_v44 = vsel %vm318_vm9, %v319_v15, %v317_v41  ;;  %v310_v45 = vsel %vm309_vm10, %v1530_v47, %v308_v38  ;;  %v347_v15 = vand.u32 2147483648, %v1543_v6 }
  0xbb   :  { %v1083_v48 = vpop.eup %1082  ;;  %v732_v49 = vmax.f32 %v320_v44, 1.0  ;;  %v313_v50 = vsel %vm311_vm11, %v312_v39, %v310_v45  ;;  %v329_v51 = vmul.f32 %v1081_v43, %v1534_v53  ;;  %1096 = vrsqrt.f32 %v1558_v31  ;;  %v1580_v52 = vpop.xlane.xlu1 %177 }
  0xbc   :  { %v1582_v55 = vpop.xlane.xlu0 %175  ;;  %v731_v46 = vmax.f32 %v313_v50, 1.0  ;;  %v322_v56 = vmul.f32 %v1083_v48, %v1536_v54  ;;  %1098 = vrsqrt.f32 %v1560_v34  ;;  %v361_v39 = vand.u32 2147483648, %v1558_v31 }
  0xbd   :  { %1100 = vrcp.f32 %v732_v49  ;;  %v331_v47 = vsel %vm330_vm12, %v1534_v53, %v329_v51  ;;  %vm351_vm6 = vcmp.eq.f32.partialorder %v1560_v34, inf  ;;  %vm353_vm7 = vcmp.eq.f32.partialorder %v1560_v34, 0.0 }
  0xbe   :  { %v1085_v58 = vpop.eup %1084  ;;  %1102 = vrcp.f32 %v731_v46  ;;  %v334_v59 = vsel %vm332_vm13, %v333_v42, %v331_v47  ;;  %v324_v60 = vsel %vm323_vm14, %v1536_v54, %v322_v56  ;;  %vm372_vm8 = vcmp.eq.f32.partialorder %v1580_v52, inf }
  0xbf   :  { %v1087_v61 = vpop.eup %1086  ;;  %v734_v62 = vmax.f32 %v334_v59, 1.0  ;;  %v327_v63 = vsel %vm325_vm15, %v326_v57, %v324_v60  ;;  %v343_v3 = vmul.f32 %v1085_v58, %v1543_v6  ;;  %1104 = vrsqrt.f32 %v1580_v52  ;;  %v1600_v4 = vpop.xlane.xlu1 %181 }
  0xc0   :  { %v1602_v10 = vpop.xlane.xlu0 %179  ;;  %v1089_v11 = vpop.eup %1088  ;;  %v921_v53 = vmul.f32 %v1087_v61, %v1444_v0  ;;  %v733_v14 = vmax.f32 %v327_v63, 1.0  ;;  %vm374_vm9 = vcmp.eq.f32.partialorder %v1580_v52, 0.0  ;;  %v375_v60 = vand.u32 2147483648, %v1580_v52 }
  0xc1   :  { %v1091_v54 = vpop.eup %1090  ;;  %v919_v18 = vmul.f32 %v1089_v11, %v1446_v1  ;;  %1106 = vrcp.f32 %v734_v62  ;;  %v345_v19 = vsel %vm344_vm0, %v1543_v6, %v343_v3  ;;  %vm365_vm10 = vcmp.eq.f32.partialorder %v1582_v55, inf }
  0xc2   :  { %985 = vst [vmem:[#allocation5 + $0x10] sm:$0xff] %v921_v53  ;;  %1108 = vrcp.f32 %v733_v14  ;;  %v348_v0 = vsel %vm346_vm1, %v347_v15, %v345_v19  ;;  %v336_v22 = vmul.f32 %v1091_v54, %v1545_v7  ;;  %vm367_vm11 = vcmp.eq.f32.partialorder %v1582_v55, 0.0 }
  0xc3   :  { %v1093_v26 = vpop.eup %1092  ;;  %983 = vst [vmem:[#allocation5] sm:$0xff] %v919_v18  ;;  %v736_v27 = vmax.f32 %v348_v0, 1.0  ;;  %1110 = vrsqrt.f32 %v1582_v55  ;;  %v1619_v1 = vpop.xlane.xlu1 %185  ;;  %vm386_vm12 = vcmp.eq.f32.partialorder %v1600_v4, inf  ;;  %vm388_vm13 = vcmp.eq.f32.partialorder %v1600_v4, 0.0 }
  0xc4   :  { %v1621_v30 = vpop.xlane.xlu0 %183  ;;  %v1095_v35 = vpop.eup %1094  ;;  %v922_v6 = vmul.f32 %v1093_v26, %v1448_v2  ;;  %v338_v38 = vsel %vm337_vm2, %v1545_v7, %v336_v22  ;;  %1112 = vrsqrt.f32 %v1600_v4  ;;  %v389_v22 = vand.u32 2147483648, %v1600_v4 }
  0xc5   :  { %v1097_v41 = vpop.eup %1096  ;;  %v920_v42 = vmul.f32 %v1095_v35, %v1454_v5  ;;  %1114 = vrcp.f32 %v736_v27  ;;  %v341_v43 = vsel %vm339_vm3, %v340_v23, %v338_v38  ;;  %v354_v5 = vand.u32 2147483648, %v1560_v34 }
  0xc6   :  { %v1099_v44 = vpop.eup %1098  ;;  %986 = vst [vmem:[#allocation5 + $0x18] sm:$0xff] %v922_v6  ;;  %v735_v2 = vmax.f32 %v341_v43, 1.0  ;;  %v357_v45 = vmul.f32 %v1097_v41, %v1558_v31  ;;  %1116 = vrsqrt.f32 %v1602_v10  ;;  %vm379_vm14 = vcmp.eq.f32.partialorder %v1602_v10, inf }
  0xc7   :  { %v1101_v48 = vpop.eup %1100  ;;  %984 = vst [vmem:[#allocation5 + $0x8] sm:$0xff] %v920_v42  ;;  %v350_v49 = vmul.f32 %v1099_v44, %v1560_v34  ;;  %1118 = vrsqrt.f32 %v1619_v1  ;;  %v1640_v7 = vpop.xlane.xlu1 %189  ;;  %vm381_vm15 = vcmp.eq.f32.partialorder %v1602_v10, 0.0  ;;  %v382_v38 = vand.u32 2147483648, %v1602_v10 }
  0xc8   :  { %v1642_v50 = vpop.xlane.xlu0 %187  ;;  %v1103_v51 = vpop.eup %1102  ;;  %v924_v46 = vmul.f32 %v1101_v48, %v1460_v8  ;;  %1120 = vrcp.f32 %v735_v2  ;;  %v359_v56 = vsel %vm358_vm4, %v1558_v31, %v357_v45  ;;  %v368_v31 = vand.u32 2147483648, %v1582_v55 }
  0xc9   :  { %v1105_v47 = vpop.eup %1104  ;;  %v923_v57 = vmul.f32 %v1103_v51, %v1462_v9  ;;  %v362_v58 = vsel %vm360_vm5, %v361_v39, %v359_v56  ;;  %v352_v59 = vsel %vm351_vm6, %v1560_v34, %v350_v49  ;;  %1122 = vrsqrt.f32 %v1621_v30 }
  0xca   :  { %988 = vst [vmem:[#allocation5 + $0x28] sm:$0xff] %v924_v46  ;;  %v738_v8 = vmax.f32 %v362_v58, 1.0  ;;  %v355_v61 = vsel %vm353_vm7, %v354_v5, %v352_v59  ;;  %v371_v62 = vmul.f32 %v1105_v47, %v1580_v52  ;;  %vm400_vm0 = vcmp.eq.f32.partialorder %v1619_v1, inf }
  0xcb   :  { %v1107_v63 = vpop.eup %1106  ;;  %987 = vst [vmem:[#allocation5 + $0x20] sm:$0xff] %v923_v57  ;;  %v737_v9 = vmax.f32 %v355_v61, 1.0  ;;  %v1663_v3 = vpop.xlane.xlu1 %193  ;;  %v403_v5 = vand.u32 2147483648, %v1619_v1  ;;  %vm402_vm1 = vcmp.eq.f32.partialorder %v1619_v1, 0.0  ;;  %vm393_vm2 = vcmp.eq.f32.partialorder %v1621_v30, inf }
  0xcc   :  { %v1665_v11 = vpop.xlane.xlu0 %191  ;;  %v1109_v53 = vpop.eup %1108  ;;  %v926_v34 = vmul.f32 %v1107_v63, %v1468_v12  ;;  %1124 = vrcp.f32 %v738_v8  ;;  %v373_v14 = vsel %vm372_vm8, %v1580_v52, %v371_v62  ;;  %vm395_vm3 = vcmp.eq.f32.partialorder %v1621_v30, 0.0 }
  0xcd   :  { %v1111_v15 = vpop.eup %1110  ;;  %v925_v54 = vmul.f32 %v1109_v53, %v1470_v13  ;;  %1126 = vrcp.f32 %v737_v9  ;;  %v376_v18 = vsel %vm374_vm9, %v375_v60, %v373_v14  ;;  %vm414_vm4 = vcmp.eq.f32.partialorder %v1640_v7, inf }
  0xce   :  { %v1113_v19 = vpop.eup %1112  ;;  %990 = vst [vmem:[#allocation5 + $0x38] sm:$0xff] %v926_v34  ;;  %v740_v0 = vmax.f32 %v376_v18, 1.0  ;;  %v364_v12 = vmul.f32 %v1111_v15, %v1582_v55  ;;  %1128 = vrsqrt.f32 %v1640_v7  ;;  %vm416_vm5 = vcmp.eq.f32.partialorder %v1640_v7, 0.0 }
  0xcf   :  { %v1115_v23 = vpop.eup %1114  ;;  %989 = vst [vmem:[#allocation5 + $0x30] sm:$0xff] %v925_v54  ;;  %v385_v26 = vmul.f32 %v1113_v19, %v1600_v4  ;;  %1130 = vrsqrt.f32 %v1642_v50  ;;  %v1683_v13 = vpop.xlane.xlu1 %197  ;;  %v417_v54 = vand.u32 2147483648, %v1640_v7  ;;  %vm407_vm6 = vcmp.eq.f32.partialorder %v1642_v50, inf }
  0xd0   :  { %v1685_v52 = vpop.xlane.xlu0 %195  ;;  %v1117_v27 = vpop.eup %1116  ;;  %v928_v35 = vmul.f32 %v1115_v23, %v1476_v16  ;;  %1132 = vrcp.f32 %v740_v0  ;;  %v366_v6 = vsel %vm365_vm10, %v1582_v55, %v364_v12  ;;  %v410_v19 = vand.u32 2147483648, %v1642_v50 }
  0xd1   :  { %v1119_v39 = vpop.eup %1118  ;;  %v369_v41 = vsel %vm367_vm11, %v368_v31, %v366_v6  ;;  %v387_v42 = vsel %vm386_vm12, %v1600_v4, %v385_v26  ;;  %v378_v43 = vmul.f32 %v1117_v27, %v1602_v10  ;;  %1134 = vrsqrt.f32 %v1663_v3 }
  0xd2   :  { %v1121_v16 = vpop.eup %1120  ;;  %992 = vst [vmem:[#allocation5 + $0x48] sm:$0xff] %v928_v35  ;;  %v739_v44 = vmax.f32 %v369_v41, 1.0  ;;  %v390_v2 = vsel %vm388_vm13, %v389_v22, %v387_v42  ;;  %v399_v45 = vmul.f32 %v1119_v39, %v1619_v1  ;;  %vm409_vm7 = vcmp.eq.f32.partialorder %v1642_v50, 0.0 }
  0xd3   :  { %v927_v55 = vmul.f32 %v1121_v16, %v1478_v17  ;;  %v742_v48 = vmax.f32 %v390_v2, 1.0  ;;  %v380_v49 = vsel %vm379_vm14, %v1602_v10, %v378_v43  ;;  %v1708_v51 = vpop.xlane.xlu1 %201  ;;  %v1123_v17 = vpop.eup %1122  ;;  %vm428_vm8 = vcmp.eq.f32.partialorder %v1663_v3, inf }
  0xd4   :  { %v1710_v46 = vpop.xlane.xlu0 %199  ;;  %1136 = vrcp.f32 %v739_v44  ;;  %v383_v4 = vsel %vm381_vm15, %v382_v38, %v380_v49  ;;  %v401_v56 = vsel %vm400_vm0, %v1619_v1, %v399_v45  ;;  %v392_v60 = vmul.f32 %v1123_v17, %v1621_v30 }
  0xd5   :  { %991 = vst [vmem:[#allocation5 + $0x40] sm:$0xff] %v927_v55  ;;  %1138 = vrcp.f32 %v742_v48  ;;  %v741_v47 = vmax.f32 %v383_v4, 1.0  ;;  %v404_v57 = vsel %vm402_vm1, %v403_v5, %v401_v56  ;;  %v396_v1 = vand.u32 2147483648, %v1621_v30 }
  0xd6   :  { %v1125_v58 = vpop.eup %1124  ;;  %v744_v59 = vmax.f32 %v404_v57, 1.0  ;;  %1140 = vrsqrt.f32 %v1665_v11  ;;  %v394_v31 = vsel %vm393_vm2, %v1621_v30, %v392_v60  ;;  %vm430_vm9 = vcmp.eq.f32.partialorder %v1663_v3, 0.0 }
  0xd7   :  { %v1127_v8 = vpop.eup %1126  ;;  %v930_v10 = vmul.f32 %v1125_v58, %v1484_v20  ;;  %1142 = vrcp.f32 %v741_v47  ;;  %v1722_v61 = vpop.xlane.xlu1 %205  ;;  %v397_v20 = vsel %vm395_vm3, %v396_v1, %v394_v31  ;;  %vm421_vm10 = vcmp.eq.f32.partialorder %v1665_v11, inf }
  0xd8   :  { %v1724_v62 = vpop.xlane.xlu0 %203  ;;  %v1129_v63 = vpop.eup %1128  ;;  %v929_v9 = vmul.f32 %v1127_v8, %v1486_v21  ;;  %1144 = vrcp.f32 %v744_v59  ;;  %v743_v15 = vmax.f32 %v397_v20, 1.0  ;;  %vm423_vm11 = vcmp.eq.f32.partialorder %v1665_v11, 0.0 }
  0xd9   :  { %v1131_v53 = vpop.eup %1130  ;;  %994 = vst [vmem:[#allocation5 + $0x58] sm:$0xff] %v930_v10  ;;  %v413_v34 = vmul.f32 %v1129_v63, %v1640_v7  ;;  %1146 = vrsqrt.f32 %v1683_v13  ;;  %vm442_vm12 = vcmp.eq.f32.partialorder %v1683_v13, inf  ;;  %vm444_vm13 = vcmp.eq.f32.partialorder %v1683_v13, 0.0 }
  0xda   :  { %v1133_v14 = vpop.eup %1132  ;;  %993 = vst [vmem:[#allocation5 + $0x50] sm:$0xff] %v929_v9  ;;  %v406_v21 = vmul.f32 %v1131_v53, %v1642_v50  ;;  %1148 = vrsqrt.f32 %v1685_v52  ;;  %v445_v56 = vand.u32 2147483648, %v1683_v13  ;;  %vm435_vm14 = vcmp.eq.f32.partialorder %v1685_v52, inf }
  0xdb   :  { %v932_v30 = vmul.f32 %v1133_v14, %v1492_v24  ;;  %v415_v18 = vsel %vm414_vm4, %v1640_v7, %v413_v34  ;;  %v1739_v0 = vpop.xlane.xlu1 %209  ;;  %v1135_v22 = vpop.eup %1134  ;;  %1150 = vrcp.f32 %v743_v15  ;;  %v431_v7 = vand.u32 2147483648, %v1663_v3 }
  0xdc   :  { %v1741_v12 = vpop.xlane.xlu0 %207  ;;  %v418_v23 = vsel %vm416_vm5, %v417_v54, %v415_v18  ;;  %v408_v26 = vsel %vm407_vm6, %v1642_v50, %v406_v21  ;;  %v427_v35 = vmul.f32 %v1135_v22, %v1663_v3  ;;  %1152 = vrsqrt.f32 %v1708_v51 }
  0xdd   :  { %996 = vst [vmem:[#allocation5 + $0x68] sm:$0xff] %v932_v30  ;;  %v746_v24 = vmax.f32 %v418_v23, 1.0  ;;  %v411_v27 = vsel %vm409_vm7, %v410_v19, %v408_v26  ;;  %vm437_vm15 = vcmp.eq.f32.partialorder %v1685_v52, 0.0  ;;  %v438_v60 = vand.u32 2147483648, %v1685_v52 }
  0xde   :  { %v1137_v6 = vpop.eup %1136  ;;  %v745_v38 = vmax.f32 %v411_v27, 1.0  ;;  %v429_v50 = vsel %vm428_vm8, %v1663_v3, %v427_v35  ;;  %v424_v3 = vand.u32 2147483648, %v1665_v11  ;;  %vm456_vm0 = vcmp.eq.f32.partialorder %v1708_v51, inf }
  0xdf   :  { %v1139_v39 = vpop.eup %1138  ;;  %v931_v41 = vmul.f32 %v1137_v6, %v1494_v25  ;;  %1154 = vrcp.f32 %v746_v24  ;;  %v1755_v42 = vpop.xlane.xlu1 %213  ;;  %v432_v2 = vsel %vm430_vm9, %v431_v7, %v429_v50  ;;  %vm458_vm1 = vcmp.eq.f32.partialorder %v1708_v51, 0.0 }
  0xe0   :  { %v1757_v43 = vpop.xlane.xlu0 %211  ;;  %v1141_v16 = vpop.eup %1140  ;;  %v934_v44 = vmul.f32 %v1139_v39, %v1500_v28  ;;  %1156 = vrcp.f32 %v745_v38  ;;  %v748_v55 = vmax.f32 %v432_v2, 1.0  ;;  %v459_v15 = vand.u32 2147483648, %v1708_v51 }
  0xe1   :  { %v1143_v45 = vpop.eup %1142  ;;  %995 = vst [vmem:[#allocation5 + $0x60] sm:$0xff] %v931_v41  ;;  %v420_v25 = vmul.f32 %v1141_v16, %v1665_v11  ;;  %1158 = vrsqrt.f32 %v1710_v46  ;;  %vm449_vm2 = vcmp.eq.f32.partialorder %v1710_v46, inf  ;;  %vm451_vm3 = vcmp.eq.f32.partialorder %v1710_v46, 0.0 }
  0xe2   :  { %v1145_v48 = vpop.eup %1144  ;;  %998 = vst [vmem:[#allocation5 + $0x78] sm:$0xff] %v934_v44  ;;  %v933_v49 = vmul.f32 %v1143_v45, %v1502_v29  ;;  %1160 = vrsqrt.f32 %v1722_v61  ;;  %v452_v30 = vand.u32 2147483648, %v1710_v46  ;;  %vm470_vm4 = vcmp.eq.f32.partialorder %v1722_v61, inf }
  0xe3   :  { %v1147_v28 = vpop.eup %1146  ;;  %v936_v5 = vmul.f32 %v1145_v48, %v1508_v32  ;;  %1162 = vrcp.f32 %v748_v55  ;;  %v422_v4 = vsel %vm421_vm10, %v1665_v11, %v420_v25  ;;  %v1773_v17 = vpop.xlane.xlu1 %217  ;;  %vm472_vm5 = vcmp.eq.f32.partialorder %v1722_v61, 0.0  ;;  %v1324_v48 = vld [vmem:[#allocation2 + $0xa0] sm:$0xff] }
  0xe4   :  { %v1775_v47 = vpop.xlane.xlu0 %215  ;;  %v1149_v29 = vpop.eup %1148  ;;  %997 = vst [vmem:[#allocation5 + $0x70] sm:$0xff] %v933_v49  ;;  %v425_v57 = vsel %vm423_vm11, %v424_v3, %v422_v4  ;;  %v441_v58 = vmul.f32 %v1147_v28, %v1683_v13  ;;  %1164 = vrsqrt.f32 %v1724_v62  ;;  %vm463_vm6 = vcmp.eq.f32.partialorder %v1724_v62, inf }
  0xe5   :  { %1000 = vst [vmem:[#allocation5 + $0x88] sm:$0xff] %v936_v5  ;;  %v747_v32 = vmax.f32 %v425_v57, 1.0  ;;  %v434_v59 = vmul.f32 %v1149_v29, %v1685_v52  ;;  %v1151_v8 = vpop.eup %1150  ;;  %1166 = vrsqrt.f32 %v1739_v0  ;;  %vm465_vm7 = vcmp.eq.f32.partialorder %v1724_v62, 0.0 }
  0xe6   :  { %v443_v11 = vsel %vm442_vm12, %v1683_v13, %v441_v58  ;;  %v1153_v10 = vpop.eup %1152  ;;  %v935_v1 = vmul.f32 %v1151_v8, %v1510_v33  ;;  %v466_v16 = vand.u32 2147483648, %v1724_v62  ;;  %vm484_vm8 = vcmp.eq.f32.partialorder %v1739_v0, inf }
  0xe7   :  { %1168 = vrcp.f32 %v747_v32  ;;  %v446_v63 = vsel %vm444_vm13, %v445_v56, %v443_v11  ;;  %v436_v9 = vsel %vm435_vm14, %v1685_v52, %v434_v59  ;;  %v1797_v31 = vpop.xlane.xlu1 %221  ;;  %v455_v14 = vmul.f32 %v1153_v10, %v1708_v51  ;;  %v1325_v59 = vld [vmem:[#allocation2 + $0xb8] sm:$0xff]  ;;  %v1326_v10 = vld [vmem:[#allocation2 + $0xb0] sm:$0xff] }
  0xe8   :  { %v1799_v53 = vpop.xlane.xlu0 %219  ;;  %v750_v20 = vmax.f32 %v446_v63, 1.0  ;;  %v439_v34 = vsel %vm437_vm15, %v438_v60, %v436_v9  ;;  %999 = vst [vmem:[#allocation5 + $0x80] sm:$0xff] %v935_v1  ;;  %1170 = vrsqrt.f32 %v1741_v12  ;;  %vm486_vm9 = vcmp.eq.f32.partialorder %v1739_v0, 0.0 }
  0xe9   :  { %v1155_v54 = vpop.eup %1154  ;;  %v749_v33 = vmax.f32 %v439_v34, 1.0  ;;  %v457_v21 = vsel %vm456_vm0, %v1708_v51, %v455_v14  ;;  %v473_v51 = vand.u32 2147483648, %v1722_v61  ;;  %v487_v28 = vand.u32 2147483648, %v1739_v0 }
  0xea   :  { %v1157_v13 = vpop.eup %1156  ;;  %v938_v52 = vmul.f32 %v1155_v54, %v1516_v36  ;;  %1172 = vrcp.f32 %v750_v20  ;;  %v460_v22 = vsel %vm458_vm1, %v459_v15, %v457_v21  ;;  %vm477_vm10 = vcmp.eq.f32.partialorder %v1741_v12, inf }
  0xeb   :  { %v1159_v18 = vpop.eup %1158  ;;  %v937_v19 = vmul.f32 %v1157_v13, %v1518_v37  ;;  %1174 = vrcp.f32 %v749_v33  ;;  %v1815_v23 = vpop.xlane.xlu1 %225  ;;  %v752_v36 = vmax.f32 %v460_v22, 1.0  ;;  %vm479_vm11 = vcmp.eq.f32.partialorder %v1741_v12, 0.0 }
  0xec   :  { %v1161_v26 = vpop.eup %1160  ;;  %1002 = vst [vmem:[#allocation5 + $0x98] sm:$0xff] %v938_v52  ;;  %v448_v24 = vmul.f32 %v1159_v18, %v1710_v46  ;;  %1176 = vrsqrt.f32 %v1755_v42  ;;  %v1824_v35 = vpop.xlane.xlu0 %223  ;;  %vm498_vm12 = vcmp.eq.f32.partialorder %v1755_v42, inf  ;;  %vm500_vm13 = vcmp.eq.f32.partialorder %v1755_v42, 0.0  ;;  %v1327_v52 = vld [vmem:[#allocation2 + $0xc8] sm:$0xff] }
  0xed   :  { %v1163_v27 = vpop.eup %1162  ;;  %1001 = vst [vmem:[#allocation5 + $0x90] sm:$0xff] %v937_v19  ;;  %v469_v37 = vmul.f32 %v1161_v26, %v1722_v61  ;;  %1178 = vrsqrt.f32 %v1757_v43  ;;  %v501_v33 = vand.u32 2147483648, %v1755_v42  ;;  %vm491_vm14 = vcmp.eq.f32.partialorder %v1757_v43, inf }
  0xee   :  { %v1165_v6 = vpop.eup %1164  ;;  %v940_v38 = vmul.f32 %v1163_v27, %v1524_v40  ;;  %1180 = vrcp.f32 %v752_v36  ;;  %v450_v7 = vsel %vm449_vm2, %v1710_v46, %v448_v24  ;;  %vm493_vm15 = vcmp.eq.f32.partialorder %v1757_v43, 0.0 }
  0xef   :  { %v453_v39 = vsel %vm451_vm3, %v452_v30, %v450_v7  ;;  %v471_v41 = vsel %vm470_vm4, %v1722_v61, %v469_v37  ;;  %v462_v50 = vmul.f32 %v1165_v6, %v1724_v62  ;;  %v1167_v44 = vpop.eup %1166  ;;  %1182 = vrsqrt.f32 %v1773_v17  ;;  %v1847_v3 = vpop.xlane.xlu1 %229 }
  0xf0   :  { %1004 = vst [vmem:[#allocation5 + $0xa8] sm:$0xff] %v940_v38  ;;  %v751_v40 = vmax.f32 %v453_v39, 1.0  ;;  %v474_v2 = vsel %vm472_vm5, %v473_v51, %v471_v41  ;;  %v483_v25 = vmul.f32 %v1167_v44, %v1739_v0  ;;  %v1856_v29 = vpop.xlane.xlu0 %227  ;;  %v494_v30 = vand.u32 2147483648, %v1757_v43  ;;  %v1328_v38 = vld [vmem:[#allocation2 + $0xc0] sm:$0xff] }
  0xf1   :  { %v1169_v46 = vpop.eup %1168  ;;  %v754_v45 = vmax.f32 %v474_v2, 1.0  ;;  %v464_v55 = vsel %vm463_vm6, %v1724_v62, %v462_v50  ;;  %vm512_vm0 = vcmp.eq.f32.partialorder %v1773_v17, inf  ;;  %vm514_vm1 = vcmp.eq.f32.partialorder %v1773_v17, 0.0  ;;  %v1329_v50 = vld [vmem:[#allocation2 + $0xd8] sm:$0xff] }
  0xf2   :  { %v939_v49 = vmul.f32 %v1324_v48, %v1169_v46  ;;  %1184 = vrcp.f32 %v751_v40  ;;  %v467_v61 = vsel %vm465_vm7, %v466_v16, %v464_v55  ;;  %v1171_v5 = vpop.eup %1170  ;;  %v485_v56 = vsel %vm484_vm8, %v1739_v0, %v483_v25  ;;  %v1330_v25 = vld [vmem:[#allocation2 + $0xd0] sm:$0xff] }
  0xf3   :  { %1186 = vrcp.f32 %v754_v45  ;;  %v753_v4 = vmax.f32 %v467_v61, 1.0  ;;  %v488_v58 = vsel %vm486_vm9, %v487_v28, %v485_v56  ;;  %v476_v32 = vmul.f32 %v1171_v5, %v1741_v12  ;;  %v1871_v14 = vpop.xlane.xlu1 %233  ;;  %v1331_v56 = vld [vmem:[#allocation2 + $0xe8] sm:$0xff] }
  0xf4   :  { %v1173_v57 = vpop.eup %1172  ;;  %1003 = vst [vmem:[#allocation5 + $0xa0] sm:$0xff] %v939_v49  ;;  %1188 = vrsqrt.f32 %v1775_v47  ;;  %v756_v8 = vmax.f32 %v488_v58, 1.0  ;;  %v480_v0 = vand.u32 2147483648, %v1741_v12  ;;  %v1881_v18 = vpop.xlane.xlu0 %231  ;;  %vm505_vm2 = vcmp.eq.f32.partialorder %v1775_v47, inf }
  0xf5   :  { %v1175_v62 = vpop.eup %1174  ;;  %v942_v60 = vmul.f32 %v1325_v59, %v1173_v57  ;;  %1190 = vrcp.f32 %v753_v4  ;;  %v478_v63 = vsel %vm477_vm10, %v1741_v12, %v476_v32  ;;  %vm507_vm3 = vcmp.eq.f32.partialorder %v1775_v47, 0.0 }
  0xf6   :  { %v1177_v11 = vpop.eup %1176  ;;  %v941_v1 = vmul.f32 %v1326_v10, %v1175_v62  ;;  %1192 = vrsqrt.f32 %v1797_v31  ;;  %v481_v20 = vsel %vm479_vm11, %v480_v0, %v478_v63  ;;  %v508_v45 = vand.u32 2147483648, %v1775_v47  ;;  %v1332_v10 = vld [vmem:[#allocation2 + $0xe0] sm:$0xff] }
  0xf7   :  { %v1179_v9 = vpop.eup %1178  ;;  %1006 = vst [vmem:[#allocation5 + $0xb8] sm:$0xff] %v942_v60  ;;  %1194 = vrcp.f32 %v756_v8  ;;  %v497_v34 = vmul.f32 %v1177_v11, %v1755_v42  ;;  %v755_v54 = vmax.f32 %v481_v20, 1.0  ;;  %v1894_v39 = vpop.xlane.xlu1 %237  ;;  %vm526_vm4 = vcmp.eq.f32.partialorder %v1797_v31, inf }
  0xf8   :  { %v1181_v15 = vpop.eup %1180  ;;  %1005 = vst [vmem:[#allocation5 + $0xb0] sm:$0xff] %v941_v1  ;;  %v490_v13 = vmul.f32 %v1179_v9, %v1757_v43  ;;  %1196 = vrsqrt.f32 %v1799_v53  ;;  %vm528_vm5 = vcmp.eq.f32.partialorder %v1797_v31, 0.0  ;;  %v529_v5 = vand.u32 2147483648, %v1797_v31 }
  0xf9   :  { %v944_v21 = vmul.f32 %v1327_v52, %v1181_v15  ;;  %v499_v12 = vsel %vm498_vm12, %v1755_v42, %v497_v34  ;;  %v1183_v19 = vpop.eup %1182  ;;  %1198 = vrcp.f32 %v755_v54  ;;  %v515_v42 = vand.u32 2147483648, %v1773_v17  ;;  %v1333_v52 = vld [vmem:[#allocation2 + $0xf8] sm:$0xff] }
  0xfa   :  { %v502_v22 = vsel %vm500_vm13, %v501_v33, %v499_v12  ;;  %v492_v26 = vsel %vm491_vm14, %v1757_v43, %v490_v13  ;;  %v511_v27 = vmul.f32 %v1183_v19, %v1773_v17  ;;  %1200 = vrsqrt.f32 %v1815_v23  ;;  %v1334_v19 = vld [vmem:[#allocation2 + $0xf0] sm:$0xff] }
  0xfb   :  { %1008 = vst [vmem:[#allocation5 + $0xc8] sm:$0xff] %v944_v21  ;;  %v758_v36 = vmax.f32 %v502_v22, 1.0  ;;  %v495_v24 = vsel %vm493_vm15, %v494_v30, %v492_v26  ;;  %vm519_vm6 = vcmp.eq.f32.partialorder %v1799_v53, inf  ;;  %vm521_vm7 = vcmp.eq.f32.partialorder %v1799_v53, 0.0  ;;  %v1919_v60 = vpop.xlane.xlu1 %241 }
  0xfc   :  { %v1185_v37 = vpop.eup %1184  ;;  %v757_v51 = vmax.f32 %v495_v24, 1.0  ;;  %v513_v43 = vsel %vm512_vm0, %v1773_v17, %v511_v27  ;;  %v1900_v17 = vpop.xlane.xlu0 %235  ;;  %v522_v0 = vand.u32 2147483648, %v1799_v53  ;;  %vm540_vm8 = vcmp.eq.f32.partialorder %v1815_v23, inf }
  0xfd   :  { %v1187_v6 = vpop.eup %1186  ;;  %v943_v7 = vmul.f32 %v1328_v38, %v1185_v37  ;;  %1202 = vrcp.f32 %v758_v36  ;;  %v516_v44 = vsel %vm514_vm1, %v515_v42, %v513_v43  ;;  %vm542_vm9 = vcmp.eq.f32.partialorder %v1815_v23, 0.0 }
  0xfe   :  { %v1189_v41 = vpop.eup %1188  ;;  %v946_v16 = vmul.f32 %v1329_v50, %v1187_v6  ;;  %1204 = vrcp.f32 %v757_v51  ;;  %v760_v2 = vmax.f32 %v516_v44, 1.0  ;;  %v543_v15 = vand.u32 2147483648, %v1815_v23 }
  0xff   :  { %v1191_v40 = vpop.eup %1190  ;;  %1007 = vst [vmem:[#allocation5 + $0xc0] sm:$0xff] %v943_v7  ;;  %v504_v46 = vmul.f32 %v1189_v41, %v1775_v47  ;;  %1206 = vrsqrt.f32 %v1824_v35  ;;  %vm533_vm10 = vcmp.eq.f32.partialorder %v1824_v35, inf  ;;  %vm535_vm11 = vcmp.eq.f32.partialorder %v1824_v35, 0.0  ;;  %v1944_v36 = vpop.xlane.xlu1 %245  ;;  %v1335_v7 = vld [vmem:[#allocation2 + $0x108] sm:$0xff] }
 0x100   :  { %v1193_v55 = vpop.eup %1192  ;;  %1010 = vst [vmem:[#allocation5 + $0xd8] sm:$0xff] %v946_v16  ;;  %v945_v48 = vmul.f32 %v1330_v25, %v1191_v40  ;;  %1208 = vrsqrt.f32 %v1847_v3  ;;  %v1929_v20 = vpop.xlane.xlu0 %239  ;;  %v536_v12 = vand.u32 2147483648, %v1824_v35  ;;  %vm554_vm12 = vcmp.eq.f32.partialorder %v1847_v3, inf }
 0x101   :  { %v1195_v49 = vpop.eup %1194  ;;  %1210 = vrcp.f32 %v760_v2  ;;  %v506_v61 = vsel %vm505_vm2, %v1775_v47, %v504_v46  ;;  %v525_v28 = vmul.f32 %v1193_v55, %v1797_v31  ;;  %vm556_vm13 = vcmp.eq.f32.partialorder %v1847_v3, 0.0 }
 0x102   :  { %v1197_v4 = vpop.eup %1196  ;;  %1009 = vst [vmem:[#allocation5 + $0xd0] sm:$0xff] %v945_v48  ;;  %v948_v57 = vmul.f32 %v1331_v56, %v1195_v49  ;;  %v509_v58 = vsel %vm507_vm3, %v508_v45, %v506_v61  ;;  %1212 = vrsqrt.f32 %v1856_v29  ;;  %vm547_vm14 = vcmp.eq.f32.partialorder %v1856_v29, inf  ;;  %v1336_v61 = vld [vmem:[#allocation2 + $0x100] sm:$0xff] }
 0x103   :  { %v759_v32 = vmax.f32 %v509_v58, 1.0  ;;  %v527_v62 = vsel %vm526_vm4, %v1797_v31, %v525_v28  ;;  %v518_v59 = vmul.f32 %v1197_v4, %v1799_v53  ;;  %v1199_v8 = vpop.eup %1198  ;;  %1214 = vrsqrt.f32 %v1871_v14  ;;  %v1975_v49 = vpop.xlane.xlu1 %249 }
 0x104   :  { %1012 = vst [vmem:[#allocation5 + $0xe8] sm:$0xff] %v948_v57  ;;  %v530_v47 = vsel %vm528_vm5, %v529_v5, %v527_v62  ;;  %v1201_v11 = vpop.eup %1200  ;;  %v947_v1 = vmul.f32 %v1332_v10, %v1199_v8  ;;  %v1953_v6 = vpop.xlane.xlu0 %243  ;;  %vm549_vm15 = vcmp.eq.f32.partialorder %v1856_v29, 0.0  ;;  %v550_v40 = vand.u32 2147483648, %v1856_v29  ;;  %v1337_v62 = vld [vmem:[#allocation2 + $0x118] sm:$0xff] }
 0x105   :  { %1216 = vrcp.f32 %v759_v32  ;;  %v762_v63 = vmax.f32 %v530_v47, 1.0  ;;  %v520_v9 = vsel %vm519_vm6, %v1799_v53, %v518_v59  ;;  %v539_v31 = vmul.f32 %v1201_v11, %v1815_v23 }
 0x106   :  { %v523_v34 = vsel %vm521_vm7, %v522_v0, %v520_v9  ;;  %1011 = vst [vmem:[#allocation5 + $0xe0] sm:$0xff] %v947_v1  ;;  %vm568_vm0 = vcmp.eq.f32.partialorder %v1871_v14, inf  ;;  %vm570_vm1 = vcmp.eq.f32.partialorder %v1871_v14, 0.0  ;;  %v571_v5 = vand.u32 2147483648, %v1871_v14  ;;  %v1338_v1 = vld [vmem:[#allocation2 + $0x110] sm:$0xff] }
 0x107   :  { %v1203_v54 = vpop.eup %1202  ;;  %1218 = vrcp.f32 %v762_v63  ;;  %v761_v33 = vmax.f32 %v523_v34, 1.0  ;;  %v541_v21 = vsel %vm540_vm8, %v1815_v23, %v539_v31  ;;  %v557_v23 = vand.u32 2147483648, %v1847_v3 }
 0x108   :  { %v1205_v13 = vpop.eup %1204  ;;  %v950_v53 = vmul.f32 %v1333_v52, %v1203_v54  ;;  %1220 = vrsqrt.f32 %v1881_v18  ;;  %v544_v26 = vsel %vm542_vm9, %v543_v15, %v541_v21  ;;  %vm561_vm2 = vcmp.eq.f32.partialorder %v1881_v18, inf  ;;  %v1984_v58 = vpop.xlane.xlu0 %247  ;;  %v1339_v52 = vld [vmem:[#allocation2 + $0x128] sm:$0xff] }
 0x109   :  { %v1207_v30 = vpop.eup %1206  ;;  %v949_v22 = vmul.f32 %v1334_v19, %v1205_v13  ;;  %1222 = vrcp.f32 %v761_v33  ;;  %v764_v27 = vmax.f32 %v544_v26, 1.0  ;;  %vm563_vm3 = vcmp.eq.f32.partialorder %v1881_v18, 0.0  ;;  %v2000_v15 = vpop.xlane.xlu1 %253 }
 0x10a   :  { %v1209_v24 = vpop.eup %1208  ;;  %1014 = vst [vmem:[#allocation5 + $0xf8] sm:$0xff] %v950_v53  ;;  %v532_v37 = vmul.f32 %v1207_v30, %v1824_v35  ;;  %1224 = vrsqrt.f32 %v1894_v39  ;;  %v564_v11 = vand.u32 2147483648, %v1881_v18  ;;  %vm582_vm4 = vcmp.eq.f32.partialorder %v1894_v39, inf }
 0x10b   :  { %v1211_v51 = vpop.eup %1210  ;;  %1013 = vst [vmem:[#allocation5 + $0xf0] sm:$0xff] %v949_v22  ;;  %v553_v42 = vmul.f32 %v1209_v24, %v1847_v3  ;;  %1226 = vrsqrt.f32 %v1900_v17  ;;  %vm584_vm5 = vcmp.eq.f32.partialorder %v1894_v39, 0.0  ;;  %v585_v31 = vand.u32 2147483648, %v1894_v39 }
 0x10c   :  { %v1213_v38 = vpop.eup %1212  ;;  %v952_v43 = vmul.f32 %v1335_v7, %v1211_v51  ;;  %1228 = vrcp.f32 %v764_v27  ;;  %v534_v41 = vsel %vm533_vm10, %v1824_v35, %v532_v37  ;;  %vm575_vm6 = vcmp.eq.f32.partialorder %v1900_v17, inf  ;;  %v2011_v19 = vpop.xlane.xlu0 %251 }
 0x10d   :  { %v537_v50 = vsel %vm535_vm11, %v536_v12, %v534_v41  ;;  %v555_v16 = vsel %vm554_vm12, %v1847_v3, %v553_v42  ;;  %v546_v44 = vmul.f32 %v1213_v38, %v1856_v29  ;;  %v1215_v2 = vpop.eup %1214  ;;  %1230 = vrsqrt.f32 %v1919_v60  ;;  %v1340_v38 = vld [vmem:[#allocation2 + $0x120] sm:$0xff] }
 0x10e   :  { %1016 = vst [vmem:[#allocation5 + $0x108] sm:$0xff] %v952_v43  ;;  %v763_v46 = vmax.f32 %v537_v50, 1.0  ;;  %v558_v45 = vsel %vm556_vm13, %v557_v23, %v555_v16  ;;  %v567_v48 = vmul.f32 %v1215_v2, %v1871_v14  ;;  %v578_v30 = vand.u32 2147483648, %v1900_v17  ;;  %v2024_v43 = vpop.xlane.xlu1 %257  ;;  %v1341_v50 = vld [vmem:[#allocation2 + $0x138] sm:$0xff] }
 0x10f   :  { %v1217_v35 = vpop.eup %1216  ;;  %v766_v55 = vmax.f32 %v558_v45, 1.0  ;;  %v548_v25 = vsel %vm547_vm14, %v1856_v29, %v546_v44  ;;  %vm577_vm7 = vcmp.eq.f32.partialorder %v1900_v17, 0.0  ;;  %vm596_vm8 = vcmp.eq.f32.partialorder %v1919_v60, inf }
 0x110   :  { %v951_v28 = vmul.f32 %v1336_v61, %v1217_v35  ;;  %1232 = vrcp.f32 %v763_v46  ;;  %v551_v3 = vsel %vm549_vm15, %v550_v40, %v548_v25  ;;  %v569_v57 = vsel %vm568_vm0, %v1871_v14, %v567_v48 }
 0x111   :  { %v1219_v4 = vpop.eup %1218  ;;  %1234 = vrcp.f32 %v766_v55  ;;  %v765_v56 = vmax.f32 %v551_v3, 1.0  ;;  %v572_v29 = vsel %vm570_vm1, %v571_v5, %v569_v57  ;;  %vm598_vm9 = vcmp.eq.f32.partialorder %v1919_v60, 0.0  ;;  %v1342_v55 = vld [vmem:[#allocation2 + $0x130] sm:$0xff] }
 0x112   :  { %v1221_v32 = vpop.eup %1220  ;;  %1015 = vst [vmem:[#allocation5 + $0x100] sm:$0xff] %v951_v28  ;;  %v954_v59 = vmul.f32 %v1337_v62, %v1219_v4  ;;  %1236 = vrsqrt.f32 %v1929_v20  ;;  %v768_v47 = vmax.f32 %v572_v29, 1.0  ;;  %vm589_vm10 = vcmp.eq.f32.partialorder %v1929_v20, inf  ;;  %v1343_v4 = vld [vmem:[#allocation2 + $0x148] sm:$0xff]  ;;  %v2049_v29 = vpop.xlane.xlu1 %261 }
 0x113   :  { %v1223_v8 = vpop.eup %1222  ;;  %1238 = vrcp.f32 %v765_v56  ;;  %v560_v0 = vmul.f32 %v1221_v32, %v1881_v18  ;;  %vm591_vm11 = vcmp.eq.f32.partialorder %v1929_v20, 0.0  ;;  %v592_v45 = vand.u32 2147483648, %v1929_v20 }
 0x114   :  { %v1225_v10 = vpop.eup %1224  ;;  %1018 = vst [vmem:[#allocation5 + $0x118] sm:$0xff] %v954_v59  ;;  %v953_v63 = vmul.f32 %v1338_v1, %v1223_v8  ;;  %1240 = vrsqrt.f32 %v1944_v36  ;;  %vm610_vm12 = vcmp.eq.f32.partialorder %v1944_v36, inf  ;;  %vm612_vm13 = vcmp.eq.f32.partialorder %v1944_v36, 0.0 }
 0x115   :  { %v1227_v14 = vpop.eup %1226  ;;  %1242 = vrcp.f32 %v768_v47  ;;  %v562_v9 = vsel %vm561_vm2, %v1881_v18, %v560_v0  ;;  %v581_v34 = vmul.f32 %v1225_v10, %v1894_v39  ;;  %v613_v3 = vand.u32 2147483648, %v1944_v36 }
 0x116   :  { %v1229_v54 = vpop.eup %1228  ;;  %1017 = vst [vmem:[#allocation5 + $0x110] sm:$0xff] %v953_v63  ;;  %v565_v33 = vsel %vm563_vm3, %v564_v11, %v562_v9  ;;  %v574_v13 = vmul.f32 %v1227_v14, %v1900_v17  ;;  %1244 = vrsqrt.f32 %v1953_v6  ;;  %vm603_vm14 = vcmp.eq.f32.partialorder %v1953_v6, inf  ;;  %v1344_v14 = vld [vmem:[#allocation2 + $0x140] sm:$0xff] }
 0x117   :  { %v956_v53 = vmul.f32 %v1339_v52, %v1229_v54  ;;  %v767_v21 = vmax.f32 %v565_v33, 1.0  ;;  %v583_v12 = vsel %vm582_vm4, %v1894_v39, %v581_v34  ;;  %v1231_v22 = vpop.eup %1230  ;;  %1246 = vrsqrt.f32 %v1975_v49  ;;  %v1345_v52 = vld [vmem:[#allocation2 + $0x158] sm:$0xff] }
 0x118   :  { %v586_v18 = vsel %vm584_vm5, %v585_v31, %v583_v12  ;;  %v576_v26 = vsel %vm575_vm6, %v1900_v17, %v574_v13  ;;  %v595_v37 = vmul.f32 %v1231_v22, %v1919_v60  ;;  %v599_v39 = vand.u32 2147483648, %v1919_v60  ;;  %v1346_v12 = vld [vmem:[#allocation2 + $0x150] sm:$0xff] }
 0x119   :  { %1020 = vst [vmem:[#allocation5 + $0x128] sm:$0xff] %v956_v53  ;;  %1248 = vrcp.f32 %v767_v21  ;;  %v770_v24 = vmax.f32 %v586_v18, 1.0  ;;  %v579_v27 = vsel %vm577_vm7, %v578_v30, %v576_v26  ;;  %vm605_vm15 = vcmp.eq.f32.partialorder %v1953_v6, 0.0  ;;  %v2073_v26 = vpop.xlane.xlu1 %265 }
 0x11a   :  { %v1233_v51 = vpop.eup %1232  ;;  %v769_v42 = vmax.f32 %v579_v27, 1.0  ;;  %v597_v17 = vsel %vm596_vm8, %v1919_v60, %v595_v37  ;;  %v2030_v60 = vpop.xlane.xlu0 %255  ;;  %v606_v47 = vand.u32 2147483648, %v1953_v6  ;;  %vm624_vm0 = vcmp.eq.f32.partialorder %v1975_v49, inf }
 0x11b   :  { %v1235_v23 = vpop.eup %1234  ;;  %v955_v7 = vmul.f32 %v1340_v38, %v1233_v51  ;;  %1250 = vrcp.f32 %v770_v24  ;;  %v600_v44 = vsel %vm598_vm9, %v599_v39, %v597_v17  ;;  %vm626_vm1 = vcmp.eq.f32.partialorder %v1975_v49, 0.0 }
 0x11c   :  { %v1237_v41 = vpop.eup %1236  ;;  %v958_v16 = vmul.f32 %v1341_v50, %v1235_v23  ;;  %1252 = vrcp.f32 %v769_v42  ;;  %v772_v2 = vmax.f32 %v600_v44, 1.0  ;;  %v627_v34 = vand.u32 2147483648, %v1975_v49  ;;  %v1347_v23 = vld [vmem:[#allocation2 + $0x168] sm:$0xff] }
 0x11d   :  { %v1239_v40 = vpop.eup %1238  ;;  %1019 = vst [vmem:[#allocation5 + $0x120] sm:$0xff] %v955_v7  ;;  %v588_v46 = vmul.f32 %v1237_v41, %v1929_v20  ;;  %1254 = vrsqrt.f32 %v1984_v58  ;;  %vm617_vm2 = vcmp.eq.f32.partialorder %v1984_v58, inf  ;;  %vm619_vm3 = vcmp.eq.f32.partialorder %v1984_v58, 0.0 }
 0x11e   :  { %v1241_v35 = vpop.eup %1240  ;;  %1022 = vst [vmem:[#allocation5 + $0x138] sm:$0xff] %v958_v16  ;;  %v957_v25 = vmul.f32 %v1342_v55, %v1239_v40  ;;  %1256 = vrsqrt.f32 %v2000_v15  ;;  %v2060_v63 = vpop.xlane.xlu0 %259  ;;  %v620_v18 = vand.u32 2147483648, %v1984_v58  ;;  %vm638_vm4 = vcmp.eq.f32.partialorder %v2000_v15, inf }
 0x11f   :  { %v1243_v48 = vpop.eup %1242  ;;  %1258 = vrcp.f32 %v772_v2  ;;  %v590_v61 = vsel %vm589_vm10, %v1929_v20, %v588_v46  ;;  %v609_v28 = vmul.f32 %v1241_v35, %v1944_v36  ;;  %vm640_vm5 = vcmp.eq.f32.partialorder %v2000_v15, 0.0  ;;  %v2105_v55 = vpop.xlane.xlu1 %269 }
 0x120   :  { %v1245_v5 = vpop.eup %1244  ;;  %1021 = vst [vmem:[#allocation5 + $0x130] sm:$0xff] %v957_v25  ;;  %v960_v56 = vmul.f32 %v1343_v4, %v1243_v48  ;;  %v593_v57 = vsel %vm591_vm11, %v592_v45, %v590_v61  ;;  %1260 = vrsqrt.f32 %v2011_v19  ;;  %v641_v51 = vand.u32 2147483648, %v2000_v15  ;;  %v1348_v25 = vld [vmem:[#allocation2 + $0x160] sm:$0xff] }
 0x121   :  { %v771_v32 = vmax.f32 %v593_v57, 1.0  ;;  %v611_v62 = vsel %vm610_vm12, %v1944_v36, %v609_v28  ;;  %v602_v59 = vmul.f32 %v1245_v5, %v1953_v6  ;;  %v1247_v8 = vpop.eup %1246  ;;  %1262 = vrsqrt.f32 %v2024_v43  ;;  %v1349_v57 = vld [vmem:[#allocation2 + $0x178] sm:$0xff] }
 0x122   :  { %1024 = vst [vmem:[#allocation5 + $0x148] sm:$0xff] %v960_v56  ;;  %v614_v20 = vsel %vm612_vm13, %v613_v3, %v611_v62  ;;  %v623_v1 = vmul.f32 %v1247_v8, %v1975_v49  ;;  %vm631_vm6 = vcmp.eq.f32.partialorder %v2011_v19, inf  ;;  %v2082_v42 = vpop.xlane.xlu0 %263  ;;  %vm633_vm7 = vcmp.eq.f32.partialorder %v2011_v19, 0.0 }
 0x123   :  { %v1249_v0 = vpop.eup %1248  ;;  %1264 = vrcp.f32 %v771_v32  ;;  %v774_v11 = vmax.f32 %v614_v20, 1.0  ;;  %v604_v10 = vsel %vm603_vm14, %v1953_v6, %v602_v59  ;;  %v634_v16 = vand.u32 2147483648, %v2011_v19 }
 0x124   :  { %v959_v36 = vmul.f32 %v1344_v14, %v1249_v0  ;;  %v607_v9 = vsel %vm605_vm15, %v606_v47, %v604_v10  ;;  %v625_v33 = vsel %vm624_vm0, %v1975_v49, %v623_v1  ;;  %vm652_vm8 = vcmp.eq.f32.partialorder %v2024_v43, inf  ;;  %v1350_v0 = vld [vmem:[#allocation2 + $0x170] sm:$0xff] }
 0x125   :  { %v1251_v31 = vpop.eup %1250  ;;  %1266 = vrcp.f32 %v774_v11  ;;  %v773_v54 = vmax.f32 %v607_v9, 1.0  ;;  %v628_v21 = vsel %vm626_vm1, %v627_v34, %v625_v33  ;;  %vm654_vm9 = vcmp.eq.f32.partialorder %v2024_v43, 0.0  ;;  %v1351_v34 = vld [vmem:[#allocation2 + $0x188] sm:$0xff] }
 0x126   :  { %v1253_v13 = vpop.eup %1252  ;;  %1023 = vst [vmem:[#allocation5 + $0x140] sm:$0xff] %v959_v36  ;;  %v962_v53 = vmul.f32 %v1345_v52, %v1251_v31  ;;  %1268 = vrsqrt.f32 %v2030_v60  ;;  %v776_v22 = vmax.f32 %v628_v21, 1.0  ;;  %v655_v61 = vand.u32 2147483648, %v2024_v43  ;;  %v2114_v4 = vpop.xlane.xlu0 %267 }
 0x127   :  { %v1255_v6 = vpop.eup %1254  ;;  %v961_v30 = vmul.f32 %v1346_v12, %v1253_v13  ;;  %1270 = vrcp.f32 %v773_v54  ;;  %vm645_vm10 = vcmp.eq.f32.partialorder %v2030_v60, inf  ;;  %vm647_vm11 = vcmp.eq.f32.partialorder %v2030_v60, 0.0  ;;  %v2130_v36 = vpop.xlane.xlu1 %273 }
 0x128   :  { %v1257_v49 = vpop.eup %1256  ;;  %1026 = vst [vmem:[#allocation5 + $0x158] sm:$0xff] %v962_v53  ;;  %v616_v24 = vmul.f32 %v1255_v6, %v1984_v58  ;;  %1272 = vrsqrt.f32 %v2049_v29  ;;  %v648_v20 = vand.u32 2147483648, %v2030_v60  ;;  %vm666_vm12 = vcmp.eq.f32.partialorder %v2049_v29, inf }
 0x129   :  { %v1259_v27 = vpop.eup %1258  ;;  %1025 = vst [vmem:[#allocation5 + $0x150] sm:$0xff] %v961_v30  ;;  %1274 = vrcp.f32 %v776_v22  ;;  %v637_v37 = vmul.f32 %v1257_v49, %v2000_v15  ;;  %vm668_vm13 = vcmp.eq.f32.partialorder %v2049_v29, 0.0  ;;  %v669_v14 = vand.u32 2147483648, %v2049_v29 }
 0x12a   :  { %v1261_v39 = vpop.eup %1260  ;;  %v964_v38 = vmul.f32 %v1347_v23, %v1259_v27  ;;  %v618_v7 = vsel %vm617_vm2, %v1984_v58, %v616_v24  ;;  %1276 = vrsqrt.f32 %v2060_v63  ;;  %vm659_vm14 = vcmp.eq.f32.partialorder %v2060_v63, inf  ;;  %v2141_v53 = vpop.xlane.xlu0 %271  ;;  %v1352_v27 = vld [vmem:[#allocation2 + $0x180] sm:$0xff] }
 0x12b   :  { %v621_v17 = vsel %vm619_vm3, %v620_v18, %v618_v7  ;;  %v639_v41 = vsel %vm638_vm4, %v2000_v15, %v637_v37  ;;  %v630_v50 = vmul.f32 %v1261_v39, %v2011_v19  ;;  %v1263_v44 = vpop.eup %1262  ;;  %1278 = vrsqrt.f32 %v2073_v26 }
 0x12c   :  { %1028 = vst [vmem:[#allocation5 + $0x168] sm:$0xff] %v964_v38  ;;  %v775_v40 = vmax.f32 %v621_v17, 1.0  ;;  %v642_v2 = vsel %vm640_vm5, %v641_v51, %v639_v41  ;;  %v651_v35 = vmul.f32 %v1263_v44, %v2024_v43  ;;  %vm661_vm15 = vcmp.eq.f32.partialorder %v2060_v63, 0.0  ;;  %v1353_v38 = vld [vmem:[#allocation2 + $0x198] sm:$0xff] }
 0x12d   :  { %v1265_v58 = vpop.eup %1264  ;;  %v778_v46 = vmax.f32 %v642_v2, 1.0  ;;  %v632_v45 = vsel %vm631_vm6, %v2011_v19, %v630_v50  ;;  %v662_v6 = vand.u32 2147483648, %v2060_v63  ;;  %vm680_vm0 = vcmp.eq.f32.partialorder %v2073_v26, inf }
 0x12e   :  { %v963_v48 = vmul.f32 %v1348_v25, %v1265_v58  ;;  %1280 = vrcp.f32 %v775_v40  ;;  %v635_v15 = vsel %vm633_vm7, %v634_v16, %v632_v45  ;;  %v653_v5 = vsel %vm652_vm8, %v2024_v43, %v651_v35  ;;  %v2161_v44 = vpop.xlane.xlu0 %275 }
 0x12f   :  { %v1267_v28 = vpop.eup %1266  ;;  %1282 = vrcp.f32 %v778_v46  ;;  %v777_v3 = vmax.f32 %v635_v15, 1.0  ;;  %v656_v19 = vsel %vm654_vm9, %v655_v61, %v653_v5  ;;  %vm682_vm1 = vcmp.eq.f32.partialorder %v2073_v26, 0.0 }
 0x130   :  { %v1269_v56 = vpop.eup %1268  ;;  %1027 = vst [vmem:[#allocation5 + $0x160] sm:$0xff] %v963_v48  ;;  %v966_v32 = vmul.f32 %v1349_v57, %v1267_v28  ;;  %1284 = vrsqrt.f32 %v2082_v42  ;;  %v780_v59 = vmax.f32 %v656_v19, 1.0  ;;  %v683_v24 = vand.u32 2147483648, %v2073_v26  ;;  %v1355_v48 = vld [vmem:[#allocation2 + $0x1a8] sm:$0xff] }
 0x131   :  { %v1271_v62 = vpop.eup %1270  ;;  %1286 = vrcp.f32 %v777_v3  ;;  %v644_v8 = vmul.f32 %v1269_v56, %v2030_v60  ;;  %vm673_vm2 = vcmp.eq.f32.partialorder %v2082_v42, inf  ;;  %vm675_vm3 = vcmp.eq.f32.partialorder %v2082_v42, 0.0 }
 0x132   :  { %v1273_v47 = vpop.eup %1272  ;;  %1030 = vst [vmem:[#allocation5 + $0x178] sm:$0xff] %v966_v32  ;;  %v965_v11 = vmul.f32 %v1350_v0, %v1271_v62  ;;  %1288 = vrsqrt.f32 %v2105_v55  ;;  %v676_v58 = vand.u32 2147483648, %v2082_v42  ;;  %vm694_vm4 = vcmp.eq.f32.partialorder %v2105_v55, inf }
 0x133   :  { %v1275_v43 = vpop.eup %1274  ;;  %1290 = vrcp.f32 %v780_v59  ;;  %v646_v10 = vsel %vm645_vm10, %v2030_v60, %v644_v8  ;;  %v665_v1 = vmul.f32 %v1273_v47, %v2049_v29  ;;  %vm696_vm5 = vcmp.eq.f32.partialorder %v2105_v55, 0.0 }
 0x134   :  { %v1277_v9 = vpop.eup %1276  ;;  %1029 = vst [vmem:[#allocation5 + $0x170] sm:$0xff] %v965_v11  ;;  %v968_v31 = vmul.f32 %v1351_v34, %v1275_v43  ;;  %v649_v54 = vsel %vm647_vm11, %v648_v20, %v646_v10  ;;  %1292 = vrsqrt.f32 %v2114_v4  ;;  %v697_v28 = vand.u32 2147483648, %v2105_v55  ;;  %v1356_v20 = vld [vmem:[#allocation2 + $0x1a0] sm:$0xff] }
 0x135   :  { %v779_v33 = vmax.f32 %v649_v54, 1.0  ;;  %v667_v13 = vsel %vm666_vm12, %v2049_v29, %v665_v1  ;;  %v658_v52 = vmul.f32 %v1277_v9, %v2060_v63  ;;  %v1279_v21 = vpop.eup %1278  ;;  %1294 = vrsqrt.f32 %v2130_v36  ;;  %v1357_v9 = vld [vmem:[#allocation2 + $0x1b8] sm:$0xff] }
 0x136   :  { %1032 = vst [vmem:[#allocation5 + $0x188] sm:$0xff] %v968_v31  ;;  %v670_v60 = vsel %vm668_vm13, %v669_v14, %v667_v13  ;;  %v679_v22 = vmul.f32 %v1279_v21, %v2073_v26  ;;  %vm687_vm6 = vcmp.eq.f32.partialorder %v2114_v4, inf  ;;  %vm689_vm7 = vcmp.eq.f32.partialorder %v2114_v4, 0.0 }
 0x137   :  { %1296 = vrcp.f32 %v779_v33  ;;  %v782_v12 = vmax.f32 %v670_v60, 1.0  ;;  %v660_v30 = vsel %vm659_vm14, %v2060_v63, %v658_v52  ;;  %v2156_v63 = vpop.xlane.xlu1 %277  ;;  %v690_v19 = vand.u32 2147483648, %v2114_v4 }
 0x138   :  { %v1281_v18 = vpop.eup %1280  ;;  %v663_v49 = vsel %vm661_vm15, %v662_v6, %v660_v30  ;;  %1298 = vrsqrt.f32 %v2141_v53  ;;  %v681_v39 = vsel %vm680_vm0, %v2073_v26, %v679_v22  ;;  %v1354_v26 = vld [vmem:[#allocation2 + $0x190] sm:$0xff]  ;;  %vm708_vm8 = vcmp.eq.f32.partialorder %v2130_v36, inf }
 0x139   :  { %v1283_v29 = vpop.eup %1282  ;;  %v967_v37 = vmul.f32 %v1352_v27, %v1281_v18  ;;  %1300 = vrcp.f32 %v782_v12  ;;  %v781_v51 = vmax.f32 %v663_v49, 1.0  ;;  %v684_v17 = vsel %vm682_vm1, %v683_v24, %v681_v39  ;;  %v1359_v18 = vld [vmem:[#allocation2 + $0x1c8] sm:$0xff] }
 0x13a   :  { %v1285_v23 = vpop.eup %1284  ;;  %v970_v7 = vmul.f32 %v1353_v38, %v1283_v29  ;;  %v784_v50 = vmax.f32 %v684_v17, 1.0  ;;  %vm710_vm9 = vcmp.eq.f32.partialorder %v2130_v36, 0.0  ;;  %v711_v11 = vand.u32 2147483648, %v2130_v36  ;;  %v1360_v38 = vld [vmem:[#allocation2 + $0x1c0] sm:$0xff] }
 0x13b   :  { %v1287_v41 = vpop.eup %1286  ;;  %1031 = vst [vmem:[#allocation5 + $0x180] sm:$0xff] %v967_v37  ;;  %1302 = vrcp.f32 %v781_v51  ;;  %v672_v16 = vmul.f32 %v1285_v23, %v2082_v42  ;;  %vm701_vm10 = vcmp.eq.f32.partialorder %v2141_v53, inf  ;;  %v704_v31 = vand.u32 2147483648, %v2141_v53 }
 0x13c   :  { %v1289_v40 = vpop.eup %1288  ;;  %1034 = vst [vmem:[#allocation5 + $0x198] sm:$0xff] %v970_v7  ;;  %v969_v2 = vmul.f32 %v1354_v26, %v1287_v41  ;;  %1304 = vrsqrt.f32 %v2156_v63  ;;  %vm703_vm11 = vcmp.eq.f32.partialorder %v2141_v53, 0.0  ;;  %vm722_vm12 = vcmp.eq.f32.partialorder %v2156_v63, inf  ;;  %v1362_v26 = vld [vmem:[#allocation2 + $0x1d0] sm:$0xff] }
 0x13d   :  { %v1291_v46 = vpop.eup %1290  ;;  %1306 = vrcp.f32 %v784_v50  ;;  %v674_v45 = vsel %vm673_vm2, %v2082_v42, %v672_v16  ;;  %v693_v35 = vmul.f32 %v1289_v40, %v2105_v55  ;;  %v725_v24 = vand.u32 2147483648, %v2156_v63  ;;  %v1361_v50 = vld [vmem:[#allocation2 + $0x1d8] sm:$0xff] }
 0x13e   :  { %v1293_v25 = vpop.eup %1292  ;;  %1033 = vst [vmem:[#allocation5 + $0x190] sm:$0xff] %v969_v2  ;;  %v972_v15 = vmul.f32 %v1355_v48, %v1291_v46  ;;  %v677_v61 = vsel %vm675_vm3, %v676_v58, %v674_v45  ;;  %1308 = vrsqrt.f32 %v2161_v44  ;;  %vm724_vm13 = vcmp.eq.f32.partialorder %v2156_v63, 0.0  ;;  %v1363_v46 = vld [vmem:[#allocation2 + $0x1e8] sm:$0xff] }
 0x13f   :  { %v783_v3 = vmax.f32 %v677_v61, 1.0  ;;  %v695_v5 = vsel %vm694_vm4, %v2105_v55, %v693_v35  ;;  %v686_v56 = vmul.f32 %v1293_v25, %v2114_v4  ;;  %v1295_v57 = vpop.eup %1294  ;;  %vm715_vm14 = vcmp.eq.f32.partialorder %v2161_v44, inf }
 0x140   :  { %1036 = vst [vmem:[#allocation5 + $0x1a8] sm:$0xff] %v972_v15  ;;  %v698_v32 = vsel %vm696_vm5, %v697_v28, %v695_v5  ;;  %v707_v55 = vmul.f32 %v1295_v57, %v2130_v36  ;;  %v718_v37 = vand.u32 2147483648, %v2161_v44  ;;  %vm717_vm15 = vcmp.eq.f32.partialorder %v2161_v44, 0.0  ;;  %v1365_v15 = vld [vmem:[#allocation2 + $0x1f8] sm:$0xff] }
 0x141   :  { %v1297_v42 = vpop.eup %1296  ;;  %1310 = vrcp.f32 %v783_v3  ;;  %v786_v62 = vmax.f32 %v698_v32, 1.0  ;;  %v688_v59 = vsel %vm687_vm6, %v2114_v4, %v686_v56  ;;  %v1366_v3 = vld [vmem:[#allocation2 + $0x1f0] sm:$0xff] }
 0x142   :  { %v1299_v8 = vpop.eup %1298  ;;  %v971_v47 = vmul.f32 %v1356_v20, %v1297_v42  ;;  %v691_v0 = vsel %vm689_vm7, %v690_v19, %v688_v59  ;;  %v709_v1 = vsel %vm708_vm8, %v2130_v36, %v707_v55  ;;  %v1358_v36 = vld [vmem:[#allocation2 + $0x1b0] sm:$0xff] }
 0x143   :  { %v1301_v43 = vpop.eup %1300  ;;  %1312 = vrcp.f32 %v786_v62  ;;  %v785_v10 = vmax.f32 %v691_v0, 1.0  ;;  %v700_v14 = vmul.f32 %v1299_v8, %v2141_v53  ;;  %v712_v34 = vsel %vm710_vm9, %v711_v11, %v709_v1 }
 0x144   :  { %1035 = vst [vmem:[#allocation5 + $0x1a0] sm:$0xff] %v971_v47  ;;  %v974_v4 = vmul.f32 %v1357_v9, %v1301_v43  ;;  %v788_v33 = vmax.f32 %v712_v34, 1.0 }
 0x145   :  { %v1303_v54 = vpop.eup %1302  ;;  %1314 = vrcp.f32 %v785_v10  ;;  %v702_v13 = vsel %vm701_vm10, %v2141_v53, %v700_v14 }
 0x146   :  { %v1305_v52 = vpop.eup %1304  ;;  %1038 = vst [vmem:[#allocation5 + $0x1b8] sm:$0xff] %v974_v4  ;;  %v973_v21 = vmul.f32 %v1358_v36, %v1303_v54  ;;  %v705_v60 = vsel %vm703_vm11, %v704_v31, %v702_v13  ;;  %1316 = vrcp.f32 %v788_v33 }
 0x147   :  { %v1307_v6 = vpop.eup %1306  ;;  %v787_v12 = vmax.f32 %v705_v60, 1.0  ;;  %v721_v30 = vmul.f32 %v1305_v52, %v2156_v63 }
 0x148   :  { %v1309_v22 = vpop.eup %1308  ;;  %1037 = vst [vmem:[#allocation5 + $0x1b0] sm:$0xff] %v973_v21  ;;  %v976_v49 = vmul.f32 %v1359_v18, %v1307_v6 }
 0x149   :  { %1318 = vrcp.f32 %v787_v12  ;;  %v723_v53 = vsel %vm722_vm12, %v2156_v63, %v721_v30  ;;  %v714_v29 = vmul.f32 %v1309_v22, %v2161_v44 }
 0x14a   :  { %1040 = vst [vmem:[#allocation5 + $0x1c8] sm:$0xff] %v976_v49  ;;  %v726_v27 = vsel %vm724_vm13, %v725_v24, %v723_v53 }
 0x14b   :  { %v1311_v51 = vpop.eup %1310  ;;  %v790_v39 = vmax.f32 %v726_v27, 1.0  ;;  %v716_v23 = vsel %vm715_vm14, %v2161_v44, %v714_v29  ;;  %v1364_v44 = vld [vmem:[#allocation2 + $0x1e0] sm:$0xff] }
 0x14c   :  { %v975_v7 = vmul.f32 %v1360_v38, %v1311_v51  ;;  %v719_v17 = vsel %vm717_vm15, %v718_v37, %v716_v23 }
 0x14d   :  { %v1313_v41 = vpop.eup %1312  ;;  %1320 = vrcp.f32 %v790_v39  ;;  %v789_v63 = vmax.f32 %v719_v17, 1.0 }
 0x14e   :  { %1039 = vst [vmem:[#allocation5 + $0x1c0] sm:$0xff] %v975_v7  ;;  %v978_v16 = vmul.f32 %v1361_v50, %v1313_v41 }
 0x14f   :  { %v1315_v40 = vpop.eup %1314  ;;  %1322 = vrcp.f32 %v789_v63 }
 0x150   :  { %1042 = vst [vmem:[#allocation5 + $0x1d8] sm:$0xff] %v978_v16  ;;  %v977_v2 = vmul.f32 %v1362_v26, %v1315_v40  ;;  %v1317_v58 = vpop.eup %1316 }
 0x151   :  { %v980_v45 = vmul.f32 %v1363_v46, %v1317_v58 }
 0x152   :  { %1041 = vst [vmem:[#allocation5 + $0x1d0] sm:$0xff] %v977_v2 }
 0x153   :  { %v1319_v35 = vpop.eup %1318  ;;  %1044 = vst [vmem:[#allocation5 + $0x1e8] sm:$0xff] %v980_v45 }
 0x154   :  { %v979_v25 = vmul.f32 %v1364_v44, %v1319_v35 }
 0x156   :  { %1043 = vst [vmem:[#allocation5 + $0x1e0] sm:$0xff] %v979_v25 }
 0x157   :  { %v1321_v48 = vpop.eup %1320 }
 0x158   :  { %v982_v61 = vmul.f32 %v1365_v15, %v1321_v48 }
 0x159   :  { %v1323_v28 = vpop.eup %1322 }
 0x15a   :  { %1046 = vst [vmem:[#allocation5 + $0x1f8] sm:$0xff] %v982_v61  ;;  %v981_v5 = vmul.f32 %v1366_v3, %v1323_v28 }
 0x15c   :  { %1045 = vst [vmem:[#allocation5 + $0x1f0] sm:$0xff] %v981_v5 }
 0x15d   :  { %1400 = shalt.err (!%p1397_p12)
}
 0x15e   :  { %s1401_s24 = scalar_lea.hbm %s2217_s1, 8192 }
 0x15f   :  { %p1402_p13 = scmp.ne.s32.totalorder %s2217_s1, %s1401_s24  ;;  %p1405_p0 = scmp.lt.u32.totalorder %s1401_s24, %s2217_s1 }
 0x161   :  { %p1407_p1 = pnand %p1405_p0, %p1402_p13 }
 0x163   :  { %1410 = shalt.err (!%p1407_p1)
}
 0x164   :  { %1058 = dma.vmem_to_hbm [thread:$0]  %s1053_s20, 8192, %s2217_s1, [#allocation4], %s1416_s16, %s1416_s16, %s1417_s17  }
 0x165   :  { %1413 = dma.done.wait [#allocation4], 8192  }
 0x166   :  { %1414 = vsyncadd [#allocation4], 4294959104 }
 0x167   :  { %1062 = vsyncpa [#allocation3], 1 }
 0x168   :  { %1063 = vsyncpa [#allocation4], 1 }

</bundles_post_ra>
